<compile_context>
chip_gen: v7x
topology: tpu7x:2x2x1
jax: 0.10.0
libtpu: 0.0.40
codegen_flags: <defaults>
</compile_context>

<pallas_src>
import functools

import jax
import jax.numpy as jnp
from jax.experimental import pallas as pl
from jax.experimental.pallas import tpu as pltpu

_NEG_BIG = -1e30  # finite stand-in for -inf (avoids inf-inf -> NaN in softmax)


def _pick(dim, pref):
    """Tile size: preferred if it divides the dim, else the full dim (toy shapes)."""
    return pref if dim % pref == 0 else dim


# ----------------------------------------------------------------------------- kernels

def _matmul_bias_kernel(x_ref, w_ref, b_ref, o_ref, acc_ref):
    # o = x @ w + b ; grid = (M/tm, N/tn, K/tk), f32 accumulation, bf16 MXU inputs.
    @pl.when(pl.program_id(2) == 0)
    def _():
        acc_ref[...] = jnp.zeros_like(acc_ref)

    acc_ref[...] += jnp.dot(
        x_ref[...].astype(jnp.bfloat16), w_ref[...],
        preferred_element_type=jnp.float32)

    @pl.when(pl.program_id(2) == pl.num_programs(2) - 1)
    def _():
        o_ref[...] = (acc_ref[...] + b_ref[...]).astype(o_ref.dtype)


def _matmul_bias_res_ln_kernel(x_ref, w_ref, b_ref, res_ref, g_ref, bt_ref,
                               o_ref, acc_ref, *, eps):
    # o = LayerNorm(x @ w + b + residual) ; grid = (M/tm, K/tk), full-E output tile.
    @pl.when(pl.program_id(1) == 0)
    def _():
        acc_ref[...] = jnp.zeros_like(acc_ref)

    acc_ref[...] += jnp.dot(
        x_ref[...].astype(jnp.bfloat16), w_ref[...],
        preferred_element_type=jnp.float32)

    @pl.when(pl.program_id(1) == pl.num_programs(1) - 1)
    def _():
        y = acc_ref[...] + b_ref[...] + res_ref[...]
        mu = jnp.mean(y, axis=-1, keepdims=True)
        var = jnp.mean((y - mu) * (y - mu), axis=-1, keepdims=True)
        o_ref[...] = ((y - mu) * jax.lax.rsqrt(var + eps) * g_ref[...]
                      + bt_ref[...]).astype(o_ref.dtype)


def _ffn_kernel(x_ref, w1_ref, b1_ref, w2_ref, b2_ref, res_ref, g_ref, bt_ref,
                o_ref, acc_ref, *, eps):
    # o = LayerNorm(fc2(relu(fc1(x))) + residual), hidden kept in VMEM only.
    # grid = (M/tm, F/tf): accumulate fc2 partials over F tiles.
    @pl.when(pl.program_id(1) == 0)
    def _():
        acc_ref[...] = jnp.zeros_like(acc_ref)

    h = jnp.dot(x_ref[...].astype(jnp.bfloat16), w1_ref[...],
                preferred_element_type=jnp.float32) + b1_ref[...]
    h = jnp.maximum(h, 0.0).astype(jnp.bfloat16)
    acc_ref[...] += jnp.dot(h, w2_ref[...], preferred_element_type=jnp.float32)

    @pl.when(pl.program_id(1) == pl.num_programs(1) - 1)
    def _():
        y = acc_ref[...] + b2_ref[...] + res_ref[...]
        mu = jnp.mean(y, axis=-1, keepdims=True)
        var = jnp.mean((y - mu) * (y - mu), axis=-1, keepdims=True)
        o_ref[...] = ((y - mu) * jax.lax.rsqrt(var + eps) * g_ref[...]
                      + bt_ref[...]).astype(o_ref.dtype)


def _self_attn_kernel(q_ref, k_ref, v_ref, m_ref, o_ref,
                      m_sc, l_sc, acc_sc, *, scale):
    # Flash-style self attention over one batch element, all heads batched.
    # q/k/v blocks: (1, H, tq|tk, Dh) bf16 ; mask block: (tq, tk) additive f32.
    ki = pl.program_id(2)

    @pl.when(ki == 0)
    def _():
        m_sc[...] = jnp.full(m_sc.shape, _NEG_BIG, jnp.float32)
        l_sc[...] = jnp.zeros_like(l_sc)
        acc_sc[...] = jnp.zeros_like(acc_sc)

    q = q_ref[0] * scale                      # bf16 (H, tq, Dh), fairseq q-scaling
    k = k_ref[0]
    v = v_ref[0]
    s = jnp.einsum("hqd,hkd->hqk", q, k, preferred_element_type=jnp.float32)
    s = s + m_ref[...][None, :, :]            # additive mask (broadcast over heads)

    m_new = jnp.maximum(m_sc[...], jnp.max(s, axis=-1, keepdims=True))
    alpha = jnp.exp(m_sc[...] - m_new)
    p = jnp.exp(s - m_new)
    l_sc[...] = alpha * l_sc[...] + jnp.sum(p, axis=-1, keepdims=True)
    acc_sc[...] = alpha * acc_sc[...] + jnp.einsum(
        "hqk,hkd->hqd", p.astype(v.dtype), v, preferred_element_type=jnp.float32)
    m_sc[...] = m_new

    @pl.when(ki == pl.num_programs(2) - 1)
    def _():
        o_ref[0] = (acc_sc[...] *
                    pl.reciprocal(l_sc[...], approx=True)).astype(o_ref.dtype)


def _cross_attn_kernel(q_ref, k_ref, v_ref, o_ref, p_ref, *, scale, inv_heads):
    # Cross attention over one batch element: full-S softmax (one K pass),
    # outputs context and head-AVERAGED probabilities (only B*T*S written).
    q = q_ref[0] * scale                      # (H, tq, Dh) bf16
    k = k_ref[0]
    v = v_ref[0]
    s = jnp.einsum("hqd,hkd->hqk", q, k, preferred_element_type=jnp.float32)
    m = jnp.max(s, axis=-1, keepdims=True)
    e = jnp.exp(s - m)
    p = e * pl.reciprocal(jnp.sum(e, axis=-1, keepdims=True), approx=True)
    o_ref[0] = jnp.einsum("hqk,hkd->hqd", p.astype(v.dtype), v,
                          preferred_element_type=jnp.float32).astype(o_ref.dtype)
    p_ref[0] = (jnp.sum(p, axis=0) * inv_heads).astype(p_ref.dtype)


# ----------------------------------------------------------------------------- wrappers

def matmul_bias(x, w, b, *, out_dtype=jnp.float32, tm=256, tn=256, tk=256):
    m, kd = x.shape
    n = w.shape[1]
    tm, tn, tk = _pick(m, tm), _pick(n, tn), _pick(kd, tk)
    grid = (m // tm, n // tn, kd // tk)
    return pl.pallas_call(
        _matmul_bias_kernel,
        out_shape=jax.ShapeDtypeStruct((m, n), out_dtype),
        grid_spec=pltpu.PrefetchScalarGridSpec(
            num_scalar_prefetch=0, grid=grid,
            in_specs=[
                pl.BlockSpec((tm, tk), lambda i, j, kk: (i, kk)),
                pl.BlockSpec((tk, tn), lambda i, j, kk: (kk, j)),
                pl.BlockSpec((1, tn), lambda i, j, kk: (0, j)),
            ],
            out_specs=pl.BlockSpec((tm, tn), lambda i, j, kk: (i, j)),
            scratch_shapes=[pltpu.VMEM((tm, tn), jnp.float32)]),
        compiler_params=pltpu.CompilerParams(
            dimension_semantics=("parallel", "parallel", "arbitrary")),
    )(x, w, b.reshape(1, n))


def matmul_bias_res_ln(x, w, b, residual, gamma, beta, *, eps=1e-5, tm=256, tk=256):
    m, kd = x.shape
    n = w.shape[1]
    tm, tk = _pick(m, tm), _pick(kd, tk)
    grid = (m // tm, kd // tk)
    return pl.pallas_call(
        functools.partial(_matmul_bias_res_ln_kernel, eps=eps),
        out_shape=jax.ShapeDtypeStruct((m, n), jnp.float32),
        grid_spec=pltpu.PrefetchScalarGridSpec(
            num_scalar_prefetch=0, grid=grid,
            in_specs=[
                pl.BlockSpec((tm, tk), lambda i, kk: (i, kk)),
                pl.BlockSpec((tk, n), lambda i, kk: (kk, 0)),
                pl.BlockSpec((1, n), lambda i, kk: (0, 0)),
                pl.BlockSpec((tm, n), lambda i, kk: (i, 0)),
                pl.BlockSpec((1, n), lambda i, kk: (0, 0)),
                pl.BlockSpec((1, n), lambda i, kk: (0, 0)),
            ],
            out_specs=pl.BlockSpec((tm, n), lambda i, kk: (i, 0)),
            scratch_shapes=[pltpu.VMEM((tm, n), jnp.float32)]),
        compiler_params=pltpu.CompilerParams(
            dimension_semantics=("parallel", "arbitrary")),
    )(x, w, b.reshape(1, n), residual, gamma.reshape(1, n), beta.reshape(1, n))


def ffn_fused(x, w1, b1, w2, b2, residual, gamma, beta, *, eps=1e-5, tm=256, tf=512):
    m, e = x.shape
    f = w1.shape[1]
    tm, tf = _pick(m, tm), _pick(f, tf)
    grid = (m // tm, f // tf)
    return pl.pallas_call(
        functools.partial(_ffn_kernel, eps=eps),
        out_shape=jax.ShapeDtypeStruct((m, e), jnp.float32),
        grid_spec=pltpu.PrefetchScalarGridSpec(
            num_scalar_prefetch=0, grid=grid,
            in_specs=[
                pl.BlockSpec((tm, e), lambda i, j: (i, 0)),
                pl.BlockSpec((e, tf), lambda i, j: (0, j)),
                pl.BlockSpec((1, tf), lambda i, j: (0, j)),
                pl.BlockSpec((tf, e), lambda i, j: (j, 0)),
                pl.BlockSpec((1, e), lambda i, j: (0, 0)),
                pl.BlockSpec((tm, e), lambda i, j: (i, 0)),
                pl.BlockSpec((1, e), lambda i, j: (0, 0)),
                pl.BlockSpec((1, e), lambda i, j: (0, 0)),
            ],
            out_specs=pl.BlockSpec((tm, e), lambda i, j: (i, 0)),
            scratch_shapes=[pltpu.VMEM((tm, e), jnp.float32)]),
        compiler_params=pltpu.CompilerParams(
            dimension_semantics=("parallel", "arbitrary")),
    )(x, w1, b1.reshape(1, f), w2, b2.reshape(1, e), residual,
      gamma.reshape(1, e), beta.reshape(1, e))


def self_attention(q, k, v, mask, *, scale, tq=128, tk=128):
    # q,k,v: (B, H, T, Dh) bf16 ; mask: (T, T) additive f32 (already clamped).
    bsz, h, t, dh = q.shape
    s = k.shape[2]
    tq, tk = _pick(t, tq), _pick(s, tk)
    grid = (bsz, t // tq, s // tk)
    return pl.pallas_call(
        functools.partial(_self_attn_kernel, scale=scale),
        out_shape=jax.ShapeDtypeStruct((bsz, h, t, dh), jnp.bfloat16),
        grid_spec=pltpu.PrefetchScalarGridSpec(
            num_scalar_prefetch=0, grid=grid,
            in_specs=[
                pl.BlockSpec((1, h, tq, dh), lambda b, qi, ki: (b, 0, qi, 0)),
                pl.BlockSpec((1, h, tk, dh), lambda b, qi, ki: (b, 0, ki, 0)),
                pl.BlockSpec((1, h, tk, dh), lambda b, qi, ki: (b, 0, ki, 0)),
                pl.BlockSpec((tq, tk), lambda b, qi, ki: (qi, ki)),
            ],
            out_specs=pl.BlockSpec((1, h, tq, dh), lambda b, qi, ki: (b, 0, qi, 0)),
            scratch_shapes=[
                pltpu.VMEM((h, tq, 1), jnp.float32),
                pltpu.VMEM((h, tq, 1), jnp.float32),
                pltpu.VMEM((h, tq, dh), jnp.float32),
            ]),
        compiler_params=pltpu.CompilerParams(
            dimension_semantics=("parallel", "parallel", "arbitrary")),
    )(q, k, v, mask)


def cross_attention(q, k, v, *, scale, tq=128):
    # q: (B, H, T, Dh), k/v: (B, H, S, Dh); single K pass (need_weights path).
    # TODO(synk): very long source lengths would need a K-tiled two-pass variant.
    bsz, h, t, dh = q.shape
    s = k.shape[2]
    tq = _pick(t, tq)
    grid = (bsz, t // tq)
    out, probs = pl.pallas_call(
        functools.partial(_cross_attn_kernel, scale=scale, inv_heads=1.0 / h),
        out_shape=(jax.ShapeDtypeStruct((bsz, h, t, dh), jnp.bfloat16),
                   jax.ShapeDtypeStruct((bsz, t, s), jnp.float32)),
        grid_spec=pltpu.PrefetchScalarGridSpec(
            num_scalar_prefetch=0, grid=grid,
            in_specs=[
                pl.BlockSpec((1, h, tq, dh), lambda b, qi: (b, 0, qi, 0)),
                pl.BlockSpec((1, h, s, dh), lambda b, qi: (b, 0, 0, 0)),
                pl.BlockSpec((1, h, s, dh), lambda b, qi: (b, 0, 0, 0)),
            ],
            out_specs=(
                pl.BlockSpec((1, h, tq, dh), lambda b, qi: (b, 0, qi, 0)),
                pl.BlockSpec((1, tq, s), lambda b, qi: (b, qi, 0)),
            )),
        compiler_params=pltpu.CompilerParams(
            dimension_semantics=("parallel", "parallel")),
    )(q, k, v)
    return out, probs


# ----------------------------------------------------------------------------- glue

def transformer_decoder_layer(x, encoder_out, self_attn_mask, params, *, num_heads):
    """x: (T, B, E), encoder_out: (S, B, E). Returns (x, attn, None)."""
    t, bsz, e = x.shape
    s = encoder_out.shape[0]
    h = num_heads
    dh = e // h
    scale = dh ** -0.5

    # one layout change to batch-major rows; everything below is (B*T, E)
    xb = jnp.transpose(x, (1, 0, 2)).reshape(bsz * t, e)
    encb = jnp.transpose(encoder_out, (1, 0, 2)).reshape(bsz * s, e)

    if self_attn_mask is None:
        mask = jnp.zeros((t, t), jnp.float32)
    else:
        mask = jnp.maximum(self_attn_mask.astype(jnp.float32), _NEG_BIG)

    # ---- self attention block (post-norm) ------------------------------------
    sa = params["self_attn"]
    qkv = matmul_bias(xb, sa["qkv_w"], sa["qkv_b"], out_dtype=jnp.bfloat16)
    qkv = qkv.reshape(bsz, t, 3, h, dh)
    q = jnp.transpose(qkv[:, :, 0], (0, 2, 1, 3))        # (B, H, T, Dh)
    k = jnp.transpose(qkv[:, :, 1], (0, 2, 1, 3))
    v = jnp.transpose(qkv[:, :, 2], (0, 2, 1, 3))
    ctx = self_attention(q, k, v, mask, scale=scale)      # (B, H, T, Dh) bf16
    ctx = jnp.transpose(ctx, (0, 2, 1, 3)).reshape(bsz * t, e)
    # dropout_module == identity in eval  # TODO(synk): training-mode dropout not modeled
    x1 = matmul_bias_res_ln(ctx, sa["o_w"], sa["o_b"], xb,
                            params["ln1_g"], params["ln1_b"])

    # ---- encoder (cross) attention block -------------------------------------
    ca = params["enc_attn"]
    q2 = matmul_bias(x1, ca["q_w"], ca["q_b"], out_dtype=jnp.bfloat16)
    kv = matmul_bias(encb, ca["kv_w"], ca["kv_b"], out_dtype=jnp.bfloat16)
    q2 = jnp.transpose(q2.reshape(bsz, t, h, dh), (0, 2, 1, 3))
    kv = kv.reshape(bsz, s, 2, h, dh)
    k2 = jnp.transpose(kv[:, :, 0], (0, 2, 1, 3))
    v2 = jnp.transpose(kv[:, :, 1], (0, 2, 1, 3))
    ctx2, attn = cross_attention(q2, k2, v2, scale=scale)  # attn: (B, T, S) avg-head
    ctx2 = jnp.transpose(ctx2, (0, 2, 1, 3)).reshape(bsz * t, e)
    x2 = matmul_bias_res_ln(ctx2, ca["o_w"], ca["o_b"], x1,
                            params["ln2_g"], params["ln2_b"])

    # ---- feed-forward block (fully fused) -------------------------------------
    x3 = ffn_fused(x2, params["fc1_w"], params["fc1_b"],
                   params["fc2_w"], params["fc2_b"], x2,
                   params["ln3_g"], params["ln3_b"])

    out = jnp.transpose(x3.reshape(bsz, t, e), (1, 0, 2))  # back to (T, B, E)
    return out, attn, None


# ----------------------------------------------------------------------------- params

def init_params(key, embed_dim, ffn_dim):
    ks = jax.random.split(key, 7)

    def lin(kk, din, dout, scale=0.02):
        kw, kb = jax.random.split(kk)
        w = (jax.random.normal(kw, (din, dout), jnp.float32) * scale).astype(jnp.bfloat16)
        bvec = jax.random.normal(kb, (dout,), jnp.float32) * scale
        return w, bvec

    qkv_w, qkv_b = lin(ks[0], embed_dim, 3 * embed_dim)   # fused q|k|v (heads packed)
    so_w, so_b = lin(ks[1], embed_dim, embed_dim)
    cq_w, cq_b = lin(ks[2], embed_dim, embed_dim)
    ckv_w, ckv_b = lin(ks[3], embed_dim, 2 * embed_dim)   # fused k|v from encoder
    co_w, co_b = lin(ks[4], embed_dim, embed_dim)
    fc1_w, fc1_b = lin(ks[5], embed_dim, ffn_dim)
    fc2_w, fc2_b = lin(ks[6], ffn_dim, embed_dim)
    ones = jnp.ones((embed_dim,), jnp.float32)
    zeros = jnp.zeros((embed_dim,), jnp.float32)
    return dict(
        self_attn=dict(qkv_w=qkv_w, qkv_b=qkv_b, o_w=so_w, o_b=so_b),
        enc_attn=dict(q_w=cq_w, q_b=cq_b, kv_w=ckv_w, kv_b=ckv_b, o_w=co_w, o_b=co_b),
        fc1_w=fc1_w, fc1_b=fc1_b, fc2_w=fc2_w, fc2_b=fc2_b,
        ln1_g=ones, ln1_b=zeros, ln2_g=ones, ln2_b=zeros, ln3_g=ones, ln3_b=zeros,
    )


# ----------------------------------------------------------------------------- main

if __name__ == "__main__":
    T, B, E, H, F, S = 8, 2, 32, 4, 64, 8   # tgt_len, batch, embed, heads, ffn, src_len

    key = jax.random.PRNGKey(0)
    kx, kenc, kp = jax.random.split(key, 3)
    x = jax.random.normal(kx, (T, B, E), jnp.float32)            # (seq, batch, embed)
    encoder_out = jax.random.normal(kenc, (S, B, E), jnp.float32)
    params = init_params(kp, E, F)

    # causal (future-masking) additive self-attn mask, like fairseq buffered_future_mask
    causal = jnp.where(
        jnp.arange(T)[:, None] >= jnp.arange(T)[None, :], 0.0, -jnp.inf
    ).astype(jnp.float32)

    fwd = jax.jit(functools.partial(transformer_decoder_layer, num_heads=H))
    out, attn, _ = fwd(x, encoder_out, causal, params)
    jax.block_until_ready((out, attn))

    assert out.shape == (T, B, E) and out.dtype == jnp.float32
    assert attn.shape == (B, T, S)
    assert bool(jnp.all(jnp.isfinite(out))) and bool(jnp.all(jnp.isfinite(attn)))
    print("KERNEL_OK")
</pallas_src>

<mosaic_0001>
module attributes {stable_mosaic.version = 11 : i64} {
  func.func @_matmul_bias_kernel(%arg0: i32, %arg1: i32, %arg2: i32, %arg3: memref<16x32xf32, #tpu.memory_space<vmem>>, %arg4: memref<32x96xbf16, #tpu.memory_space<vmem>>, %arg5: memref<1x96xf32, #tpu.memory_space<vmem>>, %arg6: memref<16x96xbf16, #tpu.memory_space<vmem>>, %arg7: memref<16x96xf32, #tpu.memory_space<vmem>>) attributes {dimension_semantics = [#tpu.dimension_semantics<parallel>, #tpu.dimension_semantics<parallel>, #tpu.dimension_semantics<arbitrary>], iteration_bounds = array<i64: 1, 1, 1>, scalar_prefetch = 0 : i64, scratch_operands = 1 : i64, tpu.core_type = #tpu.core_type<tc>, window_params = [{transform_indices = @transform_0, window_bounds = array<i64: 16, 32>}, {transform_indices = @transform_1, window_bounds = array<i64: 32, 96>}, {transform_indices = @transform_2, window_bounds = array<i64: 1, 96>}, {transform_indices = @transform_3, window_bounds = array<i64: 16, 96>}]} {
    %c0_i32 = arith.constant 0 : i32
    %0 = arith.cmpi eq, %arg2, %c0_i32 : i32
    %1 = arith.extui %0 : i1 to i32
    %c0_i32_0 = arith.constant 0 : i32
    %2 = arith.cmpi ne, %1, %c0_i32_0 : i32
    scf.if %2 {
      %cst_10 = arith.constant 0.000000e+00 : f32
      %13 = vector.broadcast %cst_10 : f32 to vector<16x96xf32>
      %c0_11 = arith.constant 0 : index
      %c0_12 = arith.constant 0 : index
      %14 = vector.load %arg7[%c0_11, %c0_12] : memref<16x96xf32, #tpu.memory_space<vmem>>, vector<16x96xf32>
      tpu.vector_store %arg7[%c0_11, %c0_12], %13 {strides = array<i32>} : memref<16x96xf32, #tpu.memory_space<vmem>>, vector<16x96xf32>,
    } else {
    }
    %c0 = arith.constant 0 : index
    %c0_1 = arith.constant 0 : index
    %3 = vector.load %arg7[%c0, %c0_1] : memref<16x96xf32, #tpu.memory_space<vmem>>, vector<16x96xf32>
    %c0_2 = arith.constant 0 : index
    %c0_3 = arith.constant 0 : index
    %4 = vector.load %arg3[%c0_2, %c0_3] : memref<16x32xf32, #tpu.memory_space<vmem>>, vector<16x32xf32>
    %5 = arith.truncf %4 : vector<16x32xf32> to vector<16x32xbf16>
    %c0_4 = arith.constant 0 : index
    %c0_5 = arith.constant 0 : index
    %6 = vector.load %arg4[%c0_4, %c0_5] : memref<32x96xbf16, #tpu.memory_space<vmem>>, vector<32x96xbf16>
    %cst = arith.constant dense<0.000000e+00> : vector<16x96xf32>
    %7 = tpu.matmul %5, %6, %cst {dimension_numbers = #tpu.dot_dimension_numbers<[1], [0], [0], [1], [0, 0, 1, 1], [], []>} : vector<16x32xbf16>, vector<32x96xbf16>, vector<16x96xf32> -> vector<16x96xf32>
    %8 = arith.addf %3, %7 : vector<16x96xf32>
    %c0_6 = arith.constant 0 : index
    %c0_7 = arith.constant 0 : index
    %9 = vector.load %arg7[%c0_6, %c0_7] : memref<16x96xf32, #tpu.memory_space<vmem>>, vector<16x96xf32>
    tpu.vector_store %arg7[%c0_6, %c0_7], %8 {strides = array<i32>} : memref<16x96xf32, #tpu.memory_space<vmem>>, vector<16x96xf32>,
    %c0_i32_8 = arith.constant 0 : i32
    %10 = arith.cmpi eq, %arg2, %c0_i32_8 : i32
    %11 = arith.extui %10 : i1 to i32
    %c0_i32_9 = arith.constant 0 : i32
    %12 = arith.cmpi ne, %11, %c0_i32_9 : i32
    scf.if %12 {
      %c0_10 = arith.constant 0 : index
      %c0_11 = arith.constant 0 : index
      %13 = vector.load %arg7[%c0_10, %c0_11] : memref<16x96xf32, #tpu.memory_space<vmem>>, vector<16x96xf32>
      %c0_12 = arith.constant 0 : index
      %c0_13 = arith.constant 0 : index
      %14 = vector.load %arg5[%c0_12, %c0_13] : memref<1x96xf32, #tpu.memory_space<vmem>>, vector<1x96xf32>
      %15 = vector.broadcast %14 : vector<1x96xf32> to vector<16x96xf32>
      %16 = arith.addf %13, %15 : vector<16x96xf32>
      %17 = arith.truncf %16 : vector<16x96xf32> to vector<16x96xbf16>
      %c0_14 = arith.constant 0 : index
      %c0_15 = arith.constant 0 : index
      %18 = vector.load %arg6[%c0_14, %c0_15] : memref<16x96xbf16, #tpu.memory_space<vmem>>, vector<16x96xbf16>
      tpu.vector_store %arg6[%c0_14, %c0_15], %17 {strides = array<i32>} : memref<16x96xbf16, #tpu.memory_space<vmem>>, vector<16x96xbf16>,
    } else {
    }
    return
  }
  func.func @transform_0(%arg0: i32, %arg1: i32, %arg2: i32) -> (i32, i32) {
    %c0_i32 = arith.constant 0 : i32
    return %arg0, %arg2 : i32, i32
  }
  func.func @transform_1(%arg0: i32, %arg1: i32, %arg2: i32) -> (i32, i32) {
    %c0_i32 = arith.constant 0 : i32
    return %arg2, %arg1 : i32, i32
  }
  func.func @transform_2(%arg0: i32, %arg1: i32, %arg2: i32) -> (i32, i32) {
    %c0_i32 = arith.constant 0 : i32
    %c0_i32_0 = arith.constant 0 : i32
    return %c0_i32, %arg1 : i32, i32
  }
  func.func @transform_3(%arg0: i32, %arg1: i32, %arg2: i32) -> (i32, i32) {
    %c0_i32 = arith.constant 0 : i32
    return %arg0, %arg1 : i32, i32
  }
}

module attributes {stable_mosaic.version = 11 : i64} {
  func.func @_self_attn_kernel(%arg0: i32, %arg1: i32, %arg2: i32, %arg3: memref<1x4x8x8xbf16, #tpu.memory_space<vmem>>, %arg4: memref<1x4x8x8xbf16, #tpu.memory_space<vmem>>, %arg5: memref<1x4x8x8xbf16, #tpu.memory_space<vmem>>, %arg6: memref<8x8xf32, #tpu.memory_space<vmem>>, %arg7: memref<1x4x8x8xbf16, #tpu.memory_space<vmem>>, %arg8: memref<4x8x1xf32, #tpu.memory_space<vmem>>, %arg9: memref<4x8x1xf32, #tpu.memory_space<vmem>>, %arg10: memref<4x8x8xf32, #tpu.memory_space<vmem>>) attributes {dimension_semantics = [#tpu.dimension_semantics<parallel>, #tpu.dimension_semantics<parallel>, #tpu.dimension_semantics<arbitrary>], iteration_bounds = array<i64: 2, 1, 1>, scalar_prefetch = 0 : i64, scratch_operands = 3 : i64, tpu.core_type = #tpu.core_type<tc>, window_params = [{transform_indices = @transform_0, window_bounds = array<i64: 1, 4, 8, 8>}, {transform_indices = @transform_1, window_bounds = array<i64: 1, 4, 8, 8>}, {transform_indices = @transform_2, window_bounds = array<i64: 1, 4, 8, 8>}, {transform_indices = @transform_3, window_bounds = array<i64: 8, 8>}, {transform_indices = @transform_4, window_bounds = array<i64: 1, 4, 8, 8>}]} {
    %c0_i32 = arith.constant 0 : i32
    %0 = arith.cmpi eq, %arg2, %c0_i32 : i32
    %1 = arith.extui %0 : i1 to i32
    %c0_i32_0 = arith.constant 0 : i32
    %2 = arith.cmpi ne, %1, %c0_i32_0 : i32
    scf.if %2 {
      %cst_41 = arith.constant -1.000000e+30 : f32
      %43 = vector.broadcast %cst_41 : f32 to vector<4x8x1xf32>
      %c0_42 = arith.constant 0 : index
      %c0_43 = arith.constant 0 : index
      %c0_44 = arith.constant 0 : index
      %44 = vector.load %arg8[%c0_42, %c0_43, %c0_44] : memref<4x8x1xf32, #tpu.memory_space<vmem>>, vector<4x8x1xf32>
      tpu.vector_store %arg8[%c0_42, %c0_43, %c0_44], %43 {strides = array<i32>} : memref<4x8x1xf32, #tpu.memory_space<vmem>>, vector<4x8x1xf32>,
      %cst_45 = arith.constant 0.000000e+00 : f32
      %45 = vector.broadcast %cst_45 : f32 to vector<4x8x1xf32>
      %c0_46 = arith.constant 0 : index
      %c0_47 = arith.constant 0 : index
      %c0_48 = arith.constant 0 : index
      %46 = vector.load %arg9[%c0_46, %c0_47, %c0_48] : memref<4x8x1xf32, #tpu.memory_space<vmem>>, vector<4x8x1xf32>
      tpu.vector_store %arg9[%c0_46, %c0_47, %c0_48], %45 {strides = array<i32>} : memref<4x8x1xf32, #tpu.memory_space<vmem>>, vector<4x8x1xf32>,
      %cst_49 = arith.constant 0.000000e+00 : f32
      %47 = vector.broadcast %cst_49 : f32 to vector<4x8x8xf32>
      %c0_50 = arith.constant 0 : index
      %c0_51 = arith.constant 0 : index
      %c0_52 = arith.constant 0 : index
      %48 = vector.load %arg10[%c0_50, %c0_51, %c0_52] : memref<4x8x8xf32, #tpu.memory_space<vmem>>, vector<4x8x8xf32>
      tpu.vector_store %arg10[%c0_50, %c0_51, %c0_52], %47 {strides = array<i32>} : memref<4x8x8xf32, #tpu.memory_space<vmem>>, vector<4x8x8xf32>,
    } else {
    }
    %c0 = arith.constant 0 : index
    %c0_1 = arith.constant 0 : index
    %c0_2 = arith.constant 0 : index
    %c0_3 = arith.constant 0 : index
    %3 = vector.load %arg3[%c0, %c0_1, %c0_2, %c0_3] : memref<1x4x8x8xbf16, #tpu.memory_space<vmem>>, vector<1x4x8x8xbf16>
    %4 = vector.shape_cast %3 : vector<1x4x8x8xbf16> to vector<4x8x8xbf16>
    %cst = arith.constant 3.535160e-01 : bf16
    %5 = vector.broadcast %cst : bf16 to vector<4x8x8xbf16>
    %6 = arith.mulf %4, %5 : vector<4x8x8xbf16>
    %c0_4 = arith.constant 0 : index
    %c0_5 = arith.constant 0 : index
    %c0_6 = arith.constant 0 : index
    %c0_7 = arith.constant 0 : index
    %7 = vector.load %arg4[%c0_4, %c0_5, %c0_6, %c0_7] : memref<1x4x8x8xbf16, #tpu.memory_space<vmem>>, vector<1x4x8x8xbf16>
    %8 = vector.shape_cast %7 : vector<1x4x8x8xbf16> to vector<4x8x8xbf16>
    %c0_8 = arith.constant 0 : index
    %c0_9 = arith.constant 0 : index
    %c0_10 = arith.constant 0 : index
    %c0_11 = arith.constant 0 : index
    %9 = vector.load %arg5[%c0_8, %c0_9, %c0_10, %c0_11] : memref<1x4x8x8xbf16, #tpu.memory_space<vmem>>, vector<1x4x8x8xbf16>
    %10 = vector.shape_cast %9 : vector<1x4x8x8xbf16> to vector<4x8x8xbf16>
    "tpu.trace_start"() <{level = 10 : i32, message = "hqd,hkd->hqk"}> : () -> ()
    %cst_12 = arith.constant dense<0.000000e+00> : vector<4x8x8xf32>
    %11 = tpu.matmul %6, %8, %cst_12 {dimension_numbers = #tpu.dot_dimension_numbers<[2], [2], [1], [1], [0, 0, 0, 1, 1, 1], [0], [0]>} : vector<4x8x8xbf16>, vector<4x8x8xbf16>, vector<4x8x8xf32> -> vector<4x8x8xf32>
    "tpu.trace_stop"() : () -> ()
    %c0_13 = arith.constant 0 : index
    %c0_14 = arith.constant 0 : index
    %12 = vector.load %arg6[%c0_13, %c0_14] : memref<8x8xf32, #tpu.memory_space<vmem>>, vector<8x8xf32>
    %13 = vector.shape_cast %12 : vector<8x8xf32> to vector<1x8x8xf32>
    %14 = vector.broadcast %13 : vector<1x8x8xf32> to vector<4x8x8xf32>
    %15 = arith.addf %11, %14 : vector<4x8x8xf32>
    %c0_15 = arith.constant 0 : index
    %c0_16 = arith.constant 0 : index
    %c0_17 = arith.constant 0 : index
    %16 = vector.load %arg8[%c0_15, %c0_16, %c0_17] : memref<4x8x1xf32, #tpu.memory_space<vmem>>, vector<4x8x1xf32>
    %cst_18 = arith.constant dense<0xFF800000> : vector<4x8xf32>
    %17 = vector.multi_reduction <maximumf>, %15, %cst_18 [2] : vector<4x8x8xf32> to vector<4x8xf32>
    %18 = vector.shape_cast %17 : vector<4x8xf32> to vector<4x8x1xf32>
    %19 = arith.maximumf %16, %18 : vector<4x8x1xf32>
    %c0_19 = arith.constant 0 : index
    %c0_20 = arith.constant 0 : index
    %c0_21 = arith.constant 0 : index
    %20 = vector.load %arg8[%c0_19, %c0_20, %c0_21] : memref<4x8x1xf32, #tpu.memory_space<vmem>>, vector<4x8x1xf32>
    %21 = arith.subf %20, %19 : vector<4x8x1xf32>
    %22 = math.exp %21 : vector<4x8x1xf32>
    %23 = vector.broadcast %19 : vector<4x8x1xf32> to vector<4x8x8xf32>
    %24 = arith.subf %15, %23 : vector<4x8x8xf32>
    %25 = math.exp %24 : vector<4x8x8xf32>
    %c0_22 = arith.constant 0 : index
    %c0_23 = arith.constant 0 : index
    %c0_24 = arith.constant 0 : index
    %26 = vector.load %arg9[%c0_22, %c0_23, %c0_24] : memref<4x8x1xf32, #tpu.memory_space<vmem>>, vector<4x8x1xf32>
    %27 = arith.mulf %22, %26 : vector<4x8x1xf32>
    %cst_25 = arith.constant dense<0.000000e+00> : vector<4x8xf32>
    %28 = vector.multi_reduction <add>, %25, %cst_25 [2] : vector<4x8x8xf32> to vector<4x8xf32>
    %29 = vector.shape_cast %28 : vector<4x8xf32> to vector<4x8x1xf32>
    %30 = arith.addf %27, %29 : vector<4x8x1xf32>
    %c0_26 = arith.constant 0 : index
    %c0_27 = arith.constant 0 : index
    %c0_28 = arith.constant 0 : index
    %31 = vector.load %arg9[%c0_26, %c0_27, %c0_28] : memref<4x8x1xf32, #tpu.memory_space<vmem>>, vector<4x8x1xf32>
    tpu.vector_store %arg9[%c0_26, %c0_27, %c0_28], %30 {strides = array<i32>} : memref<4x8x1xf32, #tpu.memory_space<vmem>>, vector<4x8x1xf32>,
    %c0_29 = arith.constant 0 : index
    %c0_30 = arith.constant 0 : index
    %c0_31 = arith.constant 0 : index
    %32 = vector.load %arg10[%c0_29, %c0_30, %c0_31] : memref<4x8x8xf32, #tpu.memory_space<vmem>>, vector<4x8x8xf32>
    %33 = vector.broadcast %22 : vector<4x8x1xf32> to vector<4x8x8xf32>
    %34 = arith.mulf %33, %32 : vector<4x8x8xf32>
    %35 = arith.truncf %25 : vector<4x8x8xf32> to vector<4x8x8xbf16>
    "tpu.trace_start"() <{level = 10 : i32, message = "hqk,hkd->hqd"}> : () -> ()
    %cst_32 = arith.constant dense<0.000000e+00> : vector<4x8x8xf32>
    %36 = tpu.matmul %35, %10, %cst_32 {dimension_numbers = #tpu.dot_dimension_numbers<[2], [1], [1], [2], [0, 0, 0, 1, 1, 2], [0], [0]>} : vector<4x8x8xbf16>, vector<4x8x8xbf16>, vector<4x8x8xf32> -> vector<4x8x8xf32>
    "tpu.trace_stop"() : () -> ()
    %37 = arith.addf %34, %36 : vector<4x8x8xf32>
    %c0_33 = arith.constant 0 : index
    %c0_34 = arith.constant 0 : index
    %c0_35 = arith.constant 0 : index
    %38 = vector.load %arg10[%c0_33, %c0_34, %c0_35] : memref<4x8x8xf32, #tpu.memory_space<vmem>>, vector<4x8x8xf32>
    tpu.vector_store %arg10[%c0_33, %c0_34, %c0_35], %37 {strides = array<i32>} : memref<4x8x8xf32, #tpu.memory_space<vmem>>, vector<4x8x8xf32>,
    %c0_36 = arith.constant 0 : index
    %c0_37 = arith.constant 0 : index
    %c0_38 = arith.constant 0 : index
    %39 = vector.load %arg8[%c0_36, %c0_37, %c0_38] : memref<4x8x1xf32, #tpu.memory_space<vmem>>, vector<4x8x1xf32>
    tpu.vector_store %arg8[%c0_36, %c0_37, %c0_38], %19 {strides = array<i32>} : memref<4x8x1xf32, #tpu.memory_space<vmem>>, vector<4x8x1xf32>,
    %c0_i32_39 = arith.constant 0 : i32
    %40 = arith.cmpi eq, %arg2, %c0_i32_39 : i32
    %41 = arith.extui %40 : i1 to i32
    %c0_i32_40 = arith.constant 0 : i32
    %42 = arith.cmpi ne, %41, %c0_i32_40 : i32
    scf.if %42 {
      %c0_41 = arith.constant 0 : index
      %c0_42 = arith.constant 0 : index
      %c0_43 = arith.constant 0 : index
      %43 = vector.load %arg10[%c0_41, %c0_42, %c0_43] : memref<4x8x8xf32, #tpu.memory_space<vmem>>, vector<4x8x8xf32>
      %c0_44 = arith.constant 0 : index
      %c0_45 = arith.constant 0 : index
      %c0_46 = arith.constant 0 : index
      %44 = vector.load %arg9[%c0_44, %c0_45, %c0_46] : memref<4x8x1xf32, #tpu.memory_space<vmem>>, vector<4x8x1xf32>
      %45 = tpu.reciprocal %44 {approx = true} : vector<4x8x1xf32> -> vector<4x8x1xf32>
      %46 = vector.broadcast %45 : vector<4x8x1xf32> to vector<4x8x8xf32>
      %47 = arith.mulf %43, %46 : vector<4x8x8xf32>
      %48 = arith.truncf %47 : vector<4x8x8xf32> to vector<4x8x8xbf16>
      %c0_47 = arith.constant 0 : index
      %c0_48 = arith.constant 0 : index
      %c0_49 = arith.constant 0 : index
      %c0_50 = arith.constant 0 : index
      %49 = vector.load %arg7[%c0_47, %c0_48, %c0_49, %c0_50] : memref<1x4x8x8xbf16, #tpu.memory_space<vmem>>, vector<1x4x8x8xbf16>
      %50 = vector.shape_cast %49 : vector<1x4x8x8xbf16> to vector<4x8x8xbf16>
      %51 = vector.shape_cast %48 : vector<4x8x8xbf16> to vector<1x4x8x8xbf16>
      tpu.vector_store %arg7[%c0_47, %c0_48, %c0_49, %c0_50], %51 {strides = array<i32>} : memref<1x4x8x8xbf16, #tpu.memory_space<vmem>>, vector<1x4x8x8xbf16>,
    } else {
    }
    return
  }
  func.func @transform_0(%arg0: i32, %arg1: i32, %arg2: i32) -> (i32, i32, i32, i32) {
    %c0_i32 = arith.constant 0 : i32
    %c0_i32_0 = arith.constant 0 : i32
    %c0_i32_1 = arith.constant 0 : i32
    return %arg0, %c0_i32, %arg1, %c0_i32_0 : i32, i32, i32, i32
  }
  func.func @transform_1(%arg0: i32, %arg1: i32, %arg2: i32) -> (i32, i32, i32, i32) {
    %c0_i32 = arith.constant 0 : i32
    %c0_i32_0 = arith.constant 0 : i32
    %c0_i32_1 = arith.constant 0 : i32
    return %arg0, %c0_i32, %arg2, %c0_i32_0 : i32, i32, i32, i32
  }
  func.func @transform_2(%arg0: i32, %arg1: i32, %arg2: i32) -> (i32, i32, i32, i32) {
    %c0_i32 = arith.constant 0 : i32
    %c0_i32_0 = arith.constant 0 : i32
    %c0_i32_1 = arith.constant 0 : i32
    return %arg0, %c0_i32, %arg2, %c0_i32_0 : i32, i32, i32, i32
  }
  func.func @transform_3(%arg0: i32, %arg1: i32, %arg2: i32) -> (i32, i32) {
    %c0_i32 = arith.constant 0 : i32
    return %arg1, %arg2 : i32, i32
  }
  func.func @transform_4(%arg0: i32, %arg1: i32, %arg2: i32) -> (i32, i32, i32, i32) {
    %c0_i32 = arith.constant 0 : i32
    %c0_i32_0 = arith.constant 0 : i32
    %c0_i32_1 = arith.constant 0 : i32
    return %arg0, %c0_i32, %arg1, %c0_i32_0 : i32, i32, i32, i32
  }
}

module attributes {stable_mosaic.version = 11 : i64} {
  func.func @_matmul_bias_res_ln_kernel(%arg0: i32, %arg1: i32, %arg2: memref<16x32xbf16, #tpu.memory_space<vmem>>, %arg3: memref<32x32xbf16, #tpu.memory_space<vmem>>, %arg4: memref<1x32xf32, #tpu.memory_space<vmem>>, %arg5: memref<16x32xf32, #tpu.memory_space<vmem>>, %arg6: memref<1x32xf32, #tpu.memory_space<vmem>>, %arg7: memref<1x32xf32, #tpu.memory_space<vmem>>, %arg8: memref<16x32xf32, #tpu.memory_space<vmem>>, %arg9: memref<16x32xf32, #tpu.memory_space<vmem>>) attributes {dimension_semantics = [#tpu.dimension_semantics<parallel>, #tpu.dimension_semantics<arbitrary>], iteration_bounds = array<i64: 1, 1>, scalar_prefetch = 0 : i64, scratch_operands = 1 : i64, tpu.core_type = #tpu.core_type<tc>, window_params = [{transform_indices = @transform_0, window_bounds = array<i64: 16, 32>}, {transform_indices = @transform_1, window_bounds = array<i64: 32, 32>}, {pipeline_mode = #tpu.pipeline_mode<synchronous>, transform_indices = @transform_2, window_bounds = array<i64: 1, 32>}, {transform_indices = @transform_3, window_bounds = array<i64: 16, 32>}, {pipeline_mode = #tpu.pipeline_mode<synchronous>, transform_indices = @transform_4, window_bounds = array<i64: 1, 32>}, {pipeline_mode = #tpu.pipeline_mode<synchronous>, transform_indices = @transform_5, window_bounds = array<i64: 1, 32>}, {transform_indices = @transform_6, window_bounds = array<i64: 16, 32>}]} {
    %c0_i32 = arith.constant 0 : i32
    %0 = arith.cmpi eq, %arg1, %c0_i32 : i32
    %1 = arith.extui %0 : i1 to i32
    %c0_i32_0 = arith.constant 0 : i32
    %2 = arith.cmpi ne, %1, %c0_i32_0 : i32
    scf.if %2 {
      %cst_10 = arith.constant 0.000000e+00 : f32
      %12 = vector.broadcast %cst_10 : f32 to vector<16x32xf32>
      %c0_11 = arith.constant 0 : index
      %c0_12 = arith.constant 0 : index
      %13 = vector.load %arg9[%c0_11, %c0_12] : memref<16x32xf32, #tpu.memory_space<vmem>>, vector<16x32xf32>
      tpu.vector_store %arg9[%c0_11, %c0_12], %12 {strides = array<i32>} : memref<16x32xf32, #tpu.memory_space<vmem>>, vector<16x32xf32>,
    } else {
    }
    %c0 = arith.constant 0 : index
    %c0_1 = arith.constant 0 : index
    %3 = vector.load %arg9[%c0, %c0_1] : memref<16x32xf32, #tpu.memory_space<vmem>>, vector<16x32xf32>
    %c0_2 = arith.constant 0 : index
    %c0_3 = arith.constant 0 : index
    %4 = vector.load %arg2[%c0_2, %c0_3] : memref<16x32xbf16, #tpu.memory_space<vmem>>, vector<16x32xbf16>
    %c0_4 = arith.constant 0 : index
    %c0_5 = arith.constant 0 : index
    %5 = vector.load %arg3[%c0_4, %c0_5] : memref<32x32xbf16, #tpu.memory_space<vmem>>, vector<32x32xbf16>
    %cst = arith.constant dense<0.000000e+00> : vector<16x32xf32>
    %6 = tpu.matmul %4, %5, %cst {dimension_numbers = #tpu.dot_dimension_numbers<[1], [0], [0], [1], [0, 0, 1, 1], [], []>} : vector<16x32xbf16>, vector<32x32xbf16>, vector<16x32xf32> -> vector<16x32xf32>
    %7 = arith.addf %3, %6 : vector<16x32xf32>
    %c0_6 = arith.constant 0 : index
    %c0_7 = arith.constant 0 : index
    %8 = vector.load %arg9[%c0_6, %c0_7] : memref<16x32xf32, #tpu.memory_space<vmem>>, vector<16x32xf32>
    tpu.vector_store %arg9[%c0_6, %c0_7], %7 {strides = array<i32>} : memref<16x32xf32, #tpu.memory_space<vmem>>, vector<16x32xf32>,
    %c0_i32_8 = arith.constant 0 : i32
    %9 = arith.cmpi eq, %arg1, %c0_i32_8 : i32
    %10 = arith.extui %9 : i1 to i32
    %c0_i32_9 = arith.constant 0 : i32
    %11 = arith.cmpi ne, %10, %c0_i32_9 : i32
    scf.if %11 {
      %c0_10 = arith.constant 0 : index
      %c0_11 = arith.constant 0 : index
      %12 = vector.load %arg9[%c0_10, %c0_11] : memref<16x32xf32, #tpu.memory_space<vmem>>, vector<16x32xf32>
      %c0_12 = arith.constant 0 : index
      %c0_13 = arith.constant 0 : index
      %13 = vector.load %arg4[%c0_12, %c0_13] : memref<1x32xf32, #tpu.memory_space<vmem>>, vector<1x32xf32>
      %14 = vector.broadcast %13 : vector<1x32xf32> to vector<16x32xf32>
      %15 = arith.addf %12, %14 : vector<16x32xf32>
      %c0_14 = arith.constant 0 : index
      %c0_15 = arith.constant 0 : index
      %16 = vector.load %arg5[%c0_14, %c0_15] : memref<16x32xf32, #tpu.memory_space<vmem>>, vector<16x32xf32>
      %17 = arith.addf %15, %16 : vector<16x32xf32>
      %cst_16 = arith.constant dense<0.000000e+00> : vector<16xf32>
      %18 = vector.multi_reduction <add>, %17, %cst_16 [1] : vector<16x32xf32> to vector<16xf32>
      %19 = vector.shape_cast %18 : vector<16xf32> to vector<16x1xf32>
      %cst_17 = arith.constant 3.200000e+01 : f32
      %20 = vector.broadcast %cst_17 : f32 to vector<16x1xf32>
      %21 = arith.divf %19, %20 : vector<16x1xf32>
      %22 = vector.broadcast %21 : vector<16x1xf32> to vector<16x32xf32>
      %23 = arith.subf %17, %22 : vector<16x32xf32>
      %24 = vector.broadcast %21 : vector<16x1xf32> to vector<16x32xf32>
      %25 = arith.subf %17, %24 : vector<16x32xf32>
      %26 = arith.mulf %23, %25 : vector<16x32xf32>
      %cst_18 = arith.constant dense<0.000000e+00> : vector<16xf32>
      %27 = vector.multi_reduction <add>, %26, %cst_18 [1] : vector<16x32xf32> to vector<16xf32>
      %28 = vector.shape_cast %27 : vector<16xf32> to vector<16x1xf32>
      %cst_19 = arith.constant 3.200000e+01 : f32
      %29 = vector.broadcast %cst_19 : f32 to vector<16x1xf32>
      %30 = arith.divf %28, %29 : vector<16x1xf32>
      %31 = vector.broadcast %21 : vector<16x1xf32> to vector<16x32xf32>
      %32 = arith.subf %17, %31 : vector<16x32xf32>
      %cst_20 = arith.constant 9.99999974E-6 : f32
      %33 = vector.broadcast %cst_20 : f32 to vector<16x1xf32>
      %34 = arith.addf %30, %33 : vector<16x1xf32>
      %35 = math.rsqrt %34 : vector<16x1xf32>
      %36 = vector.broadcast %35 : vector<16x1xf32> to vector<16x32xf32>
      %37 = arith.mulf %32, %36 : vector<16x32xf32>
      %c0_21 = arith.constant 0 : index
      %c0_22 = arith.constant 0 : index
      %38 = vector.load %arg6[%c0_21, %c0_22] : memref<1x32xf32, #tpu.memory_space<vmem>>, vector<1x32xf32>
      %39 = vector.broadcast %38 : vector<1x32xf32> to vector<16x32xf32>
      %40 = arith.mulf %37, %39 : vector<16x32xf32>
      %c0_23 = arith.constant 0 : index
      %c0_24 = arith.constant 0 : index
      %41 = vector.load %arg7[%c0_23, %c0_24] : memref<1x32xf32, #tpu.memory_space<vmem>>, vector<1x32xf32>
      %42 = vector.broadcast %41 : vector<1x32xf32> to vector<16x32xf32>
      %43 = arith.addf %40, %42 : vector<16x32xf32>
      %c0_25 = arith.constant 0 : index
      %c0_26 = arith.constant 0 : index
      %44 = vector.load %arg8[%c0_25, %c0_26] : memref<16x32xf32, #tpu.memory_space<vmem>>, vector<16x32xf32>
      tpu.vector_store %arg8[%c0_25, %c0_26], %43 {strides = array<i32>} : memref<16x32xf32, #tpu.memory_space<vmem>>, vector<16x32xf32>,
    } else {
    }
    return
  }
  func.func @transform_0(%arg0: i32, %arg1: i32) -> (i32, i32) {
    %c0_i32 = arith.constant 0 : i32
    return %arg0, %arg1 : i32, i32
  }
  func.func @transform_1(%arg0: i32, %arg1: i32) -> (i32, i32) {
    %c0_i32 = arith.constant 0 : i32
    %c0_i32_0 = arith.constant 0 : i32
    return %arg1, %c0_i32 : i32, i32
  }
  func.func @transform_2(%arg0: i32, %arg1: i32) -> (i32, i32) {
    %c0_i32 = arith.constant 0 : i32
    %c0_i32_0 = arith.constant 0 : i32
    %c0_i32_1 = arith.constant 0 : i32
    return %c0_i32, %c0_i32_0 : i32, i32
  }
  func.func @transform_3(%arg0: i32, %arg1: i32) -> (i32, i32) {
    %c0_i32 = arith.constant 0 : i32
    %c0_i32_0 = arith.constant 0 : i32
    return %arg0, %c0_i32 : i32, i32
  }
  func.func @transform_4(%arg0: i32, %arg1: i32) -> (i32, i32) {
    %c0_i32 = arith.constant 0 : i32
    %c0_i32_0 = arith.constant 0 : i32
    %c0_i32_1 = arith.constant 0 : i32
    return %c0_i32, %c0_i32_0 : i32, i32
  }
  func.func @transform_5(%arg0: i32, %arg1: i32) -> (i32, i32) {
    %c0_i32 = arith.constant 0 : i32
    %c0_i32_0 = arith.constant 0 : i32
    %c0_i32_1 = arith.constant 0 : i32
    return %c0_i32, %c0_i32_0 : i32, i32
  }
  func.func @transform_6(%arg0: i32, %arg1: i32) -> (i32, i32) {
    %c0_i32 = arith.constant 0 : i32
    %c0_i32_0 = arith.constant 0 : i32
    return %arg0, %c0_i32 : i32, i32
  }
}

module attributes {stable_mosaic.version = 11 : i64} {
  func.func @_matmul_bias_kernel(%arg0: i32, %arg1: i32, %arg2: i32, %arg3: memref<16x32xf32, #tpu.memory_space<vmem>>, %arg4: memref<32x32xbf16, #tpu.memory_space<vmem>>, %arg5: memref<1x32xf32, #tpu.memory_space<vmem>>, %arg6: memref<16x32xbf16, #tpu.memory_space<vmem>>, %arg7: memref<16x32xf32, #tpu.memory_space<vmem>>) attributes {dimension_semantics = [#tpu.dimension_semantics<parallel>, #tpu.dimension_semantics<parallel>, #tpu.dimension_semantics<arbitrary>], iteration_bounds = array<i64: 1, 1, 1>, scalar_prefetch = 0 : i64, scratch_operands = 1 : i64, tpu.core_type = #tpu.core_type<tc>, window_params = [{transform_indices = @transform_0, window_bounds = array<i64: 16, 32>}, {transform_indices = @transform_1, window_bounds = array<i64: 32, 32>}, {transform_indices = @transform_2, window_bounds = array<i64: 1, 32>}, {transform_indices = @transform_3, window_bounds = array<i64: 16, 32>}]} {
    %c0_i32 = arith.constant 0 : i32
    %0 = arith.cmpi eq, %arg2, %c0_i32 : i32
    %1 = arith.extui %0 : i1 to i32
    %c0_i32_0 = arith.constant 0 : i32
    %2 = arith.cmpi ne, %1, %c0_i32_0 : i32
    scf.if %2 {
      %cst_10 = arith.constant 0.000000e+00 : f32
      %13 = vector.broadcast %cst_10 : f32 to vector<16x32xf32>
      %c0_11 = arith.constant 0 : index
      %c0_12 = arith.constant 0 : index
      %14 = vector.load %arg7[%c0_11, %c0_12] : memref<16x32xf32, #tpu.memory_space<vmem>>, vector<16x32xf32>
      tpu.vector_store %arg7[%c0_11, %c0_12], %13 {strides = array<i32>} : memref<16x32xf32, #tpu.memory_space<vmem>>, vector<16x32xf32>,
    } else {
    }
    %c0 = arith.constant 0 : index
    %c0_1 = arith.constant 0 : index
    %3 = vector.load %arg7[%c0, %c0_1] : memref<16x32xf32, #tpu.memory_space<vmem>>, vector<16x32xf32>
    %c0_2 = arith.constant 0 : index
    %c0_3 = arith.constant 0 : index
    %4 = vector.load %arg3[%c0_2, %c0_3] : memref<16x32xf32, #tpu.memory_space<vmem>>, vector<16x32xf32>
    %5 = arith.truncf %4 : vector<16x32xf32> to vector<16x32xbf16>
    %c0_4 = arith.constant 0 : index
    %c0_5 = arith.constant 0 : index
    %6 = vector.load %arg4[%c0_4, %c0_5] : memref<32x32xbf16, #tpu.memory_space<vmem>>, vector<32x32xbf16>
    %cst = arith.constant dense<0.000000e+00> : vector<16x32xf32>
    %7 = tpu.matmul %5, %6, %cst {dimension_numbers = #tpu.dot_dimension_numbers<[1], [0], [0], [1], [0, 0, 1, 1], [], []>} : vector<16x32xbf16>, vector<32x32xbf16>, vector<16x32xf32> -> vector<16x32xf32>
    %8 = arith.addf %3, %7 : vector<16x32xf32>
    %c0_6 = arith.constant 0 : index
    %c0_7 = arith.constant 0 : index
    %9 = vector.load %arg7[%c0_6, %c0_7] : memref<16x32xf32, #tpu.memory_space<vmem>>, vector<16x32xf32>
    tpu.vector_store %arg7[%c0_6, %c0_7], %8 {strides = array<i32>} : memref<16x32xf32, #tpu.memory_space<vmem>>, vector<16x32xf32>,
    %c0_i32_8 = arith.constant 0 : i32
    %10 = arith.cmpi eq, %arg2, %c0_i32_8 : i32
    %11 = arith.extui %10 : i1 to i32
    %c0_i32_9 = arith.constant 0 : i32
    %12 = arith.cmpi ne, %11, %c0_i32_9 : i32
    scf.if %12 {
      %c0_10 = arith.constant 0 : index
      %c0_11 = arith.constant 0 : index
      %13 = vector.load %arg7[%c0_10, %c0_11] : memref<16x32xf32, #tpu.memory_space<vmem>>, vector<16x32xf32>
      %c0_12 = arith.constant 0 : index
      %c0_13 = arith.constant 0 : index
      %14 = vector.load %arg5[%c0_12, %c0_13] : memref<1x32xf32, #tpu.memory_space<vmem>>, vector<1x32xf32>
      %15 = vector.broadcast %14 : vector<1x32xf32> to vector<16x32xf32>
      %16 = arith.addf %13, %15 : vector<16x32xf32>
      %17 = arith.truncf %16 : vector<16x32xf32> to vector<16x32xbf16>
      %c0_14 = arith.constant 0 : index
      %c0_15 = arith.constant 0 : index
      %18 = vector.load %arg6[%c0_14, %c0_15] : memref<16x32xbf16, #tpu.memory_space<vmem>>, vector<16x32xbf16>
      tpu.vector_store %arg6[%c0_14, %c0_15], %17 {strides = array<i32>} : memref<16x32xbf16, #tpu.memory_space<vmem>>, vector<16x32xbf16>,
    } else {
    }
    return
  }
  func.func @transform_0(%arg0: i32, %arg1: i32, %arg2: i32) -> (i32, i32) {
    %c0_i32 = arith.constant 0 : i32
    return %arg0, %arg2 : i32, i32
  }
  func.func @transform_1(%arg0: i32, %arg1: i32, %arg2: i32) -> (i32, i32) {
    %c0_i32 = arith.constant 0 : i32
    return %arg2, %arg1 : i32, i32
  }
  func.func @transform_2(%arg0: i32, %arg1: i32, %arg2: i32) -> (i32, i32) {
    %c0_i32 = arith.constant 0 : i32
    %c0_i32_0 = arith.constant 0 : i32
    return %c0_i32, %arg1 : i32, i32
  }
  func.func @transform_3(%arg0: i32, %arg1: i32, %arg2: i32) -> (i32, i32) {
    %c0_i32 = arith.constant 0 : i32
    return %arg0, %arg1 : i32, i32
  }
}

module attributes {stable_mosaic.version = 11 : i64} {
  func.func @_matmul_bias_kernel(%arg0: i32, %arg1: i32, %arg2: i32, %arg3: memref<16x32xf32, #tpu.memory_space<vmem>>, %arg4: memref<32x64xbf16, #tpu.memory_space<vmem>>, %arg5: memref<1x64xf32, #tpu.memory_space<vmem>>, %arg6: memref<16x64xbf16, #tpu.memory_space<vmem>>, %arg7: memref<16x64xf32, #tpu.memory_space<vmem>>) attributes {dimension_semantics = [#tpu.dimension_semantics<parallel>, #tpu.dimension_semantics<parallel>, #tpu.dimension_semantics<arbitrary>], iteration_bounds = array<i64: 1, 1, 1>, scalar_prefetch = 0 : i64, scratch_operands = 1 : i64, tpu.core_type = #tpu.core_type<tc>, window_params = [{transform_indices = @transform_0, window_bounds = array<i64: 16, 32>}, {transform_indices = @transform_1, window_bounds = array<i64: 32, 64>}, {transform_indices = @transform_2, window_bounds = array<i64: 1, 64>}, {transform_indices = @transform_3, window_bounds = array<i64: 16, 64>}]} {
    %c0_i32 = arith.constant 0 : i32
    %0 = arith.cmpi eq, %arg2, %c0_i32 : i32
    %1 = arith.extui %0 : i1 to i32
    %c0_i32_0 = arith.constant 0 : i32
    %2 = arith.cmpi ne, %1, %c0_i32_0 : i32
    scf.if %2 {
      %cst_10 = arith.constant 0.000000e+00 : f32
      %13 = vector.broadcast %cst_10 : f32 to vector<16x64xf32>
      %c0_11 = arith.constant 0 : index
      %c0_12 = arith.constant 0 : index
      %14 = vector.load %arg7[%c0_11, %c0_12] : memref<16x64xf32, #tpu.memory_space<vmem>>, vector<16x64xf32>
      tpu.vector_store %arg7[%c0_11, %c0_12], %13 {strides = array<i32>} : memref<16x64xf32, #tpu.memory_space<vmem>>, vector<16x64xf32>,
    } else {
    }
    %c0 = arith.constant 0 : index
    %c0_1 = arith.constant 0 : index
    %3 = vector.load %arg7[%c0, %c0_1] : memref<16x64xf32, #tpu.memory_space<vmem>>, vector<16x64xf32>
    %c0_2 = arith.constant 0 : index
    %c0_3 = arith.constant 0 : index
    %4 = vector.load %arg3[%c0_2, %c0_3] : memref<16x32xf32, #tpu.memory_space<vmem>>, vector<16x32xf32>
    %5 = arith.truncf %4 : vector<16x32xf32> to vector<16x32xbf16>
    %c0_4 = arith.constant 0 : index
    %c0_5 = arith.constant 0 : index
    %6 = vector.load %arg4[%c0_4, %c0_5] : memref<32x64xbf16, #tpu.memory_space<vmem>>, vector<32x64xbf16>
    %cst = arith.constant dense<0.000000e+00> : vector<16x64xf32>
    %7 = tpu.matmul %5, %6, %cst {dimension_numbers = #tpu.dot_dimension_numbers<[1], [0], [0], [1], [0, 0, 1, 1], [], []>} : vector<16x32xbf16>, vector<32x64xbf16>, vector<16x64xf32> -> vector<16x64xf32>
    %8 = arith.addf %3, %7 : vector<16x64xf32>
    %c0_6 = arith.constant 0 : index
    %c0_7 = arith.constant 0 : index
    %9 = vector.load %arg7[%c0_6, %c0_7] : memref<16x64xf32, #tpu.memory_space<vmem>>, vector<16x64xf32>
    tpu.vector_store %arg7[%c0_6, %c0_7], %8 {strides = array<i32>} : memref<16x64xf32, #tpu.memory_space<vmem>>, vector<16x64xf32>,
    %c0_i32_8 = arith.constant 0 : i32
    %10 = arith.cmpi eq, %arg2, %c0_i32_8 : i32
    %11 = arith.extui %10 : i1 to i32
    %c0_i32_9 = arith.constant 0 : i32
    %12 = arith.cmpi ne, %11, %c0_i32_9 : i32
    scf.if %12 {
      %c0_10 = arith.constant 0 : index
      %c0_11 = arith.constant 0 : index
      %13 = vector.load %arg7[%c0_10, %c0_11] : memref<16x64xf32, #tpu.memory_space<vmem>>, vector<16x64xf32>
      %c0_12 = arith.constant 0 : index
      %c0_13 = arith.constant 0 : index
      %14 = vector.load %arg5[%c0_12, %c0_13] : memref<1x64xf32, #tpu.memory_space<vmem>>, vector<1x64xf32>
      %15 = vector.broadcast %14 : vector<1x64xf32> to vector<16x64xf32>
      %16 = arith.addf %13, %15 : vector<16x64xf32>
      %17 = arith.truncf %16 : vector<16x64xf32> to vector<16x64xbf16>
      %c0_14 = arith.constant 0 : index
      %c0_15 = arith.constant 0 : index
      %18 = vector.load %arg6[%c0_14, %c0_15] : memref<16x64xbf16, #tpu.memory_space<vmem>>, vector<16x64xbf16>
      tpu.vector_store %arg6[%c0_14, %c0_15], %17 {strides = array<i32>} : memref<16x64xbf16, #tpu.memory_space<vmem>>, vector<16x64xbf16>,
    } else {
    }
    return
  }
  func.func @transform_0(%arg0: i32, %arg1: i32, %arg2: i32) -> (i32, i32) {
    %c0_i32 = arith.constant 0 : i32
    return %arg0, %arg2 : i32, i32
  }
  func.func @transform_1(%arg0: i32, %arg1: i32, %arg2: i32) -> (i32, i32) {
    %c0_i32 = arith.constant 0 : i32
    return %arg2, %arg1 : i32, i32
  }
  func.func @transform_2(%arg0: i32, %arg1: i32, %arg2: i32) -> (i32, i32) {
    %c0_i32 = arith.constant 0 : i32
    %c0_i32_0 = arith.constant 0 : i32
    return %c0_i32, %arg1 : i32, i32
  }
  func.func @transform_3(%arg0: i32, %arg1: i32, %arg2: i32) -> (i32, i32) {
    %c0_i32 = arith.constant 0 : i32
    return %arg0, %arg1 : i32, i32
  }
}

module attributes {stable_mosaic.version = 11 : i64} {
  func.func @_cross_attn_kernel(%arg0: i32, %arg1: i32, %arg2: memref<1x4x8x8xbf16, #tpu.memory_space<vmem>>, %arg3: memref<1x4x8x8xbf16, #tpu.memory_space<vmem>>, %arg4: memref<1x4x8x8xbf16, #tpu.memory_space<vmem>>, %arg5: memref<1x4x8x8xbf16, #tpu.memory_space<vmem>>, %arg6: memref<1x8x8xf32, #tpu.memory_space<vmem>>) attributes {dimension_semantics = [#tpu.dimension_semantics<parallel>, #tpu.dimension_semantics<parallel>], iteration_bounds = array<i64: 2, 1>, scalar_prefetch = 0 : i64, scratch_operands = 0 : i64, tpu.core_type = #tpu.core_type<tc>, window_params = [{transform_indices = @transform_0, window_bounds = array<i64: 1, 4, 8, 8>}, {transform_indices = @transform_1, window_bounds = array<i64: 1, 4, 8, 8>}, {transform_indices = @transform_2, window_bounds = array<i64: 1, 4, 8, 8>}, {transform_indices = @transform_3, window_bounds = array<i64: 1, 4, 8, 8>}, {transform_indices = @transform_4, window_bounds = array<i64: 1, 8, 8>}]} {
    %c0 = arith.constant 0 : index
    %c0_0 = arith.constant 0 : index
    %c0_1 = arith.constant 0 : index
    %c0_2 = arith.constant 0 : index
    %0 = vector.load %arg2[%c0, %c0_0, %c0_1, %c0_2] : memref<1x4x8x8xbf16, #tpu.memory_space<vmem>>, vector<1x4x8x8xbf16>
    %1 = vector.shape_cast %0 : vector<1x4x8x8xbf16> to vector<4x8x8xbf16>
    %cst = arith.constant 3.535160e-01 : bf16
    %2 = vector.broadcast %cst : bf16 to vector<4x8x8xbf16>
    %3 = arith.mulf %1, %2 : vector<4x8x8xbf16>
    %c0_3 = arith.constant 0 : index
    %c0_4 = arith.constant 0 : index
    %c0_5 = arith.constant 0 : index
    %c0_6 = arith.constant 0 : index
    %4 = vector.load %arg3[%c0_3, %c0_4, %c0_5, %c0_6] : memref<1x4x8x8xbf16, #tpu.memory_space<vmem>>, vector<1x4x8x8xbf16>
    %5 = vector.shape_cast %4 : vector<1x4x8x8xbf16> to vector<4x8x8xbf16>
    %c0_7 = arith.constant 0 : index
    %c0_8 = arith.constant 0 : index
    %c0_9 = arith.constant 0 : index
    %c0_10 = arith.constant 0 : index
    %6 = vector.load %arg4[%c0_7, %c0_8, %c0_9, %c0_10] : memref<1x4x8x8xbf16, #tpu.memory_space<vmem>>, vector<1x4x8x8xbf16>
    %7 = vector.shape_cast %6 : vector<1x4x8x8xbf16> to vector<4x8x8xbf16>
    "tpu.trace_start"() <{level = 10 : i32, message = "hqd,hkd->hqk"}> : () -> ()
    %cst_11 = arith.constant dense<0.000000e+00> : vector<4x8x8xf32>
    %8 = tpu.matmul %3, %5, %cst_11 {dimension_numbers = #tpu.dot_dimension_numbers<[2], [2], [1], [1], [0, 0, 0, 1, 1, 1], [0], [0]>} : vector<4x8x8xbf16>, vector<4x8x8xbf16>, vector<4x8x8xf32> -> vector<4x8x8xf32>
    "tpu.trace_stop"() : () -> ()
    %cst_12 = arith.constant dense<0xFF800000> : vector<4x8xf32>
    %9 = vector.multi_reduction <maximumf>, %8, %cst_12 [2] : vector<4x8x8xf32> to vector<4x8xf32>
    %10 = vector.shape_cast %9 : vector<4x8xf32> to vector<4x8x1xf32>
    %11 = vector.broadcast %10 : vector<4x8x1xf32> to vector<4x8x8xf32>
    %12 = arith.subf %8, %11 : vector<4x8x8xf32>
    %13 = math.exp %12 : vector<4x8x8xf32>
    %cst_13 = arith.constant dense<0.000000e+00> : vector<4x8xf32>
    %14 = vector.multi_reduction <add>, %13, %cst_13 [2] : vector<4x8x8xf32> to vector<4x8xf32>
    %15 = vector.shape_cast %14 : vector<4x8xf32> to vector<4x8x1xf32>
    %16 = tpu.reciprocal %15 {approx = true} : vector<4x8x1xf32> -> vector<4x8x1xf32>
    %17 = vector.broadcast %16 : vector<4x8x1xf32> to vector<4x8x8xf32>
    %18 = arith.mulf %13, %17 : vector<4x8x8xf32>
    %19 = arith.truncf %18 : vector<4x8x8xf32> to vector<4x8x8xbf16>
    "tpu.trace_start"() <{level = 10 : i32, message = "hqk,hkd->hqd"}> : () -> ()
    %cst_14 = arith.constant dense<0.000000e+00> : vector<4x8x8xf32>
    %20 = tpu.matmul %19, %7, %cst_14 {dimension_numbers = #tpu.dot_dimension_numbers<[2], [1], [1], [2], [0, 0, 0, 1, 1, 2], [0], [0]>} : vector<4x8x8xbf16>, vector<4x8x8xbf16>, vector<4x8x8xf32> -> vector<4x8x8xf32>
    "tpu.trace_stop"() : () -> ()
    %21 = arith.truncf %20 : vector<4x8x8xf32> to vector<4x8x8xbf16>
    %c0_15 = arith.constant 0 : index
    %c0_16 = arith.constant 0 : index
    %c0_17 = arith.constant 0 : index
    %c0_18 = arith.constant 0 : index
    %22 = vector.load %arg5[%c0_15, %c0_16, %c0_17, %c0_18] : memref<1x4x8x8xbf16, #tpu.memory_space<vmem>>, vector<1x4x8x8xbf16>
    %23 = vector.shape_cast %22 : vector<1x4x8x8xbf16> to vector<4x8x8xbf16>
    %24 = vector.shape_cast %21 : vector<4x8x8xbf16> to vector<1x4x8x8xbf16>
    tpu.vector_store %arg5[%c0_15, %c0_16, %c0_17, %c0_18], %24 {strides = array<i32>} : memref<1x4x8x8xbf16, #tpu.memory_space<vmem>>, vector<1x4x8x8xbf16>,
    %cst_19 = arith.constant dense<0.000000e+00> : vector<8x8xf32>
    %25 = vector.multi_reduction <add>, %18, %cst_19 [0] : vector<4x8x8xf32> to vector<8x8xf32>
    %cst_20 = arith.constant 2.500000e-01 : f32
    %26 = vector.broadcast %cst_20 : f32 to vector<8x8xf32>
    %27 = arith.mulf %25, %26 : vector<8x8xf32>
    %c0_21 = arith.constant 0 : index
    %c0_22 = arith.constant 0 : index
    %c0_23 = arith.constant 0 : index
    %28 = vector.load %arg6[%c0_21, %c0_22, %c0_23] : memref<1x8x8xf32, #tpu.memory_space<vmem>>, vector<1x8x8xf32>
    %29 = vector.shape_cast %28 : vector<1x8x8xf32> to vector<8x8xf32>
    %30 = vector.shape_cast %27 : vector<8x8xf32> to vector<1x8x8xf32>
    tpu.vector_store %arg6[%c0_21, %c0_22, %c0_23], %30 {strides = array<i32>} : memref<1x8x8xf32, #tpu.memory_space<vmem>>, vector<1x8x8xf32>,
    return
  }
  func.func @transform_0(%arg0: i32, %arg1: i32) -> (i32, i32, i32, i32) {
    %c0_i32 = arith.constant 0 : i32
    %c0_i32_0 = arith.constant 0 : i32
    %c0_i32_1 = arith.constant 0 : i32
    return %arg0, %c0_i32, %arg1, %c0_i32_0 : i32, i32, i32, i32
  }
  func.func @transform_1(%arg0: i32, %arg1: i32) -> (i32, i32, i32, i32) {
    %c0_i32 = arith.constant 0 : i32
    %c0_i32_0 = arith.constant 0 : i32
    %c0_i32_1 = arith.constant 0 : i32
    %c0_i32_2 = arith.constant 0 : i32
    return %arg0, %c0_i32, %c0_i32_0, %c0_i32_1 : i32, i32, i32, i32
  }
  func.func @transform_2(%arg0: i32, %arg1: i32) -> (i32, i32, i32, i32) {
    %c0_i32 = arith.constant 0 : i32
    %c0_i32_0 = arith.constant 0 : i32
    %c0_i32_1 = arith.constant 0 : i32
    %c0_i32_2 = arith.constant 0 : i32
    return %arg0, %c0_i32, %c0_i32_0, %c0_i32_1 : i32, i32, i32, i32
  }
  func.func @transform_3(%arg0: i32, %arg1: i32) -> (i32, i32, i32, i32) {
    %c0_i32 = arith.constant 0 : i32
    %c0_i32_0 = arith.constant 0 : i32
    %c0_i32_1 = arith.constant 0 : i32
    return %arg0, %c0_i32, %arg1, %c0_i32_0 : i32, i32, i32, i32
  }
  func.func @transform_4(%arg0: i32, %arg1: i32) -> (i32, i32, i32) {
    %c0_i32 = arith.constant 0 : i32
    %c0_i32_0 = arith.constant 0 : i32
    return %arg0, %arg1, %c0_i32 : i32, i32, i32
  }
}

module attributes {stable_mosaic.version = 11 : i64} {
  func.func @_ffn_kernel(%arg0: i32, %arg1: i32, %arg2: memref<16x32xf32, #tpu.memory_space<vmem>>, %arg3: memref<32x64xbf16, #tpu.memory_space<vmem>>, %arg4: memref<1x64xf32, #tpu.memory_space<vmem>>, %arg5: memref<64x32xbf16, #tpu.memory_space<vmem>>, %arg6: memref<1x32xf32, #tpu.memory_space<vmem>>, %arg7: memref<16x32xf32, #tpu.memory_space<vmem>>, %arg8: memref<1x32xf32, #tpu.memory_space<vmem>>, %arg9: memref<1x32xf32, #tpu.memory_space<vmem>>, %arg10: memref<16x32xf32, #tpu.memory_space<vmem>>, %arg11: memref<16x32xf32, #tpu.memory_space<vmem>>) attributes {dimension_semantics = [#tpu.dimension_semantics<parallel>, #tpu.dimension_semantics<arbitrary>], iteration_bounds = array<i64: 1, 1>, scalar_prefetch = 0 : i64, scratch_operands = 1 : i64, tpu.core_type = #tpu.core_type<tc>, window_params = [{transform_indices = @transform_0, window_bounds = array<i64: 16, 32>}, {transform_indices = @transform_1, window_bounds = array<i64: 32, 64>}, {transform_indices = @transform_2, window_bounds = array<i64: 1, 64>}, {transform_indices = @transform_3, window_bounds = array<i64: 64, 32>}, {pipeline_mode = #tpu.pipeline_mode<synchronous>, transform_indices = @transform_4, window_bounds = array<i64: 1, 32>}, {transform_indices = @transform_5, window_bounds = array<i64: 16, 32>}, {pipeline_mode = #tpu.pipeline_mode<synchronous>, transform_indices = @transform_6, window_bounds = array<i64: 1, 32>}, {pipeline_mode = #tpu.pipeline_mode<synchronous>, transform_indices = @transform_7, window_bounds = array<i64: 1, 32>}, {transform_indices = @transform_8, window_bounds = array<i64: 16, 32>}]} {
    %c0_i32 = arith.constant 0 : i32
    %0 = arith.cmpi eq, %arg1, %c0_i32 : i32
    %1 = arith.extui %0 : i1 to i32
    %c0_i32_0 = arith.constant 0 : i32
    %2 = arith.cmpi ne, %1, %c0_i32_0 : i32
    scf.if %2 {
      %cst_16 = arith.constant 0.000000e+00 : f32
      %21 = vector.broadcast %cst_16 : f32 to vector<16x32xf32>
      %c0_17 = arith.constant 0 : index
      %c0_18 = arith.constant 0 : index
      %22 = vector.load %arg11[%c0_17, %c0_18] : memref<16x32xf32, #tpu.memory_space<vmem>>, vector<16x32xf32>
      tpu.vector_store %arg11[%c0_17, %c0_18], %21 {strides = array<i32>} : memref<16x32xf32, #tpu.memory_space<vmem>>, vector<16x32xf32>,
    } else {
    }
    %c0 = arith.constant 0 : index
    %c0_1 = arith.constant 0 : index
    %3 = vector.load %arg2[%c0, %c0_1] : memref<16x32xf32, #tpu.memory_space<vmem>>, vector<16x32xf32>
    %4 = arith.truncf %3 : vector<16x32xf32> to vector<16x32xbf16>
    %c0_2 = arith.constant 0 : index
    %c0_3 = arith.constant 0 : index
    %5 = vector.load %arg3[%c0_2, %c0_3] : memref<32x64xbf16, #tpu.memory_space<vmem>>, vector<32x64xbf16>
    %cst = arith.constant dense<0.000000e+00> : vector<16x64xf32>
    %6 = tpu.matmul %4, %5, %cst {dimension_numbers = #tpu.dot_dimension_numbers<[1], [0], [0], [1], [0, 0, 1, 1], [], []>} : vector<16x32xbf16>, vector<32x64xbf16>, vector<16x64xf32> -> vector<16x64xf32>
    %c0_4 = arith.constant 0 : index
    %c0_5 = arith.constant 0 : index
    %7 = vector.load %arg4[%c0_4, %c0_5] : memref<1x64xf32, #tpu.memory_space<vmem>>, vector<1x64xf32>
    %8 = vector.broadcast %7 : vector<1x64xf32> to vector<16x64xf32>
    %9 = arith.addf %6, %8 : vector<16x64xf32>
    %cst_6 = arith.constant 0.000000e+00 : f32
    %10 = vector.broadcast %cst_6 : f32 to vector<16x64xf32>
    %11 = arith.maximumf %9, %10 : vector<16x64xf32>
    %12 = arith.truncf %11 : vector<16x64xf32> to vector<16x64xbf16>
    %c0_7 = arith.constant 0 : index
    %c0_8 = arith.constant 0 : index
    %13 = vector.load %arg11[%c0_7, %c0_8] : memref<16x32xf32, #tpu.memory_space<vmem>>, vector<16x32xf32>
    %c0_9 = arith.constant 0 : index
    %c0_10 = arith.constant 0 : index
    %14 = vector.load %arg5[%c0_9, %c0_10] : memref<64x32xbf16, #tpu.memory_space<vmem>>, vector<64x32xbf16>
    %cst_11 = arith.constant dense<0.000000e+00> : vector<16x32xf32>
    %15 = tpu.matmul %12, %14, %cst_11 {dimension_numbers = #tpu.dot_dimension_numbers<[1], [0], [0], [1], [0, 0, 1, 1], [], []>} : vector<16x64xbf16>, vector<64x32xbf16>, vector<16x32xf32> -> vector<16x32xf32>
    %16 = arith.addf %13, %15 : vector<16x32xf32>
    %c0_12 = arith.constant 0 : index
    %c0_13 = arith.constant 0 : index
    %17 = vector.load %arg11[%c0_12, %c0_13] : memref<16x32xf32, #tpu.memory_space<vmem>>, vector<16x32xf32>
    tpu.vector_store %arg11[%c0_12, %c0_13], %16 {strides = array<i32>} : memref<16x32xf32, #tpu.memory_space<vmem>>, vector<16x32xf32>,
    %c0_i32_14 = arith.constant 0 : i32
    %18 = arith.cmpi eq, %arg1, %c0_i32_14 : i32
    %19 = arith.extui %18 : i1 to i32
    %c0_i32_15 = arith.constant 0 : i32
    %20 = arith.cmpi ne, %19, %c0_i32_15 : i32
    scf.if %20 {
      %c0_16 = arith.constant 0 : index
      %c0_17 = arith.constant 0 : index
      %21 = vector.load %arg11[%c0_16, %c0_17] : memref<16x32xf32, #tpu.memory_space<vmem>>, vector<16x32xf32>
      %c0_18 = arith.constant 0 : index
      %c0_19 = arith.constant 0 : index
      %22 = vector.load %arg6[%c0_18, %c0_19] : memref<1x32xf32, #tpu.memory_space<vmem>>, vector<1x32xf32>
      %23 = vector.broadcast %22 : vector<1x32xf32> to vector<16x32xf32>
      %24 = arith.addf %21, %23 : vector<16x32xf32>
      %c0_20 = arith.constant 0 : index
      %c0_21 = arith.constant 0 : index
      %25 = vector.load %arg7[%c0_20, %c0_21] : memref<16x32xf32, #tpu.memory_space<vmem>>, vector<16x32xf32>
      %26 = arith.addf %24, %25 : vector<16x32xf32>
      %cst_22 = arith.constant dense<0.000000e+00> : vector<16xf32>
      %27 = vector.multi_reduction <add>, %26, %cst_22 [1] : vector<16x32xf32> to vector<16xf32>
      %28 = vector.shape_cast %27 : vector<16xf32> to vector<16x1xf32>
      %cst_23 = arith.constant 3.200000e+01 : f32
      %29 = vector.broadcast %cst_23 : f32 to vector<16x1xf32>
      %30 = arith.divf %28, %29 : vector<16x1xf32>
      %31 = vector.broadcast %30 : vector<16x1xf32> to vector<16x32xf32>
      %32 = arith.subf %26, %31 : vector<16x32xf32>
      %33 = vector.broadcast %30 : vector<16x1xf32> to vector<16x32xf32>
      %34 = arith.subf %26, %33 : vector<16x32xf32>
      %35 = arith.mulf %32, %34 : vector<16x32xf32>
      %cst_24 = arith.constant dense<0.000000e+00> : vector<16xf32>
      %36 = vector.multi_reduction <add>, %35, %cst_24 [1] : vector<16x32xf32> to vector<16xf32>
      %37 = vector.shape_cast %36 : vector<16xf32> to vector<16x1xf32>
      %cst_25 = arith.constant 3.200000e+01 : f32
      %38 = vector.broadcast %cst_25 : f32 to vector<16x1xf32>
      %39 = arith.divf %37, %38 : vector<16x1xf32>
      %40 = vector.broadcast %30 : vector<16x1xf32> to vector<16x32xf32>
      %41 = arith.subf %26, %40 : vector<16x32xf32>
      %cst_26 = arith.constant 9.99999974E-6 : f32
      %42 = vector.broadcast %cst_26 : f32 to vector<16x1xf32>
      %43 = arith.addf %39, %42 : vector<16x1xf32>
      %44 = math.rsqrt %43 : vector<16x1xf32>
      %45 = vector.broadcast %44 : vector<16x1xf32> to vector<16x32xf32>
      %46 = arith.mulf %41, %45 : vector<16x32xf32>
      %c0_27 = arith.constant 0 : index
      %c0_28 = arith.constant 0 : index
      %47 = vector.load %arg8[%c0_27, %c0_28] : memref<1x32xf32, #tpu.memory_space<vmem>>, vector<1x32xf32>
      %48 = vector.broadcast %47 : vector<1x32xf32> to vector<16x32xf32>
      %49 = arith.mulf %46, %48 : vector<16x32xf32>
      %c0_29 = arith.constant 0 : index
      %c0_30 = arith.constant 0 : index
      %50 = vector.load %arg9[%c0_29, %c0_30] : memref<1x32xf32, #tpu.memory_space<vmem>>, vector<1x32xf32>
      %51 = vector.broadcast %50 : vector<1x32xf32> to vector<16x32xf32>
      %52 = arith.addf %49, %51 : vector<16x32xf32>
      %c0_31 = arith.constant 0 : index
      %c0_32 = arith.constant 0 : index
      %53 = vector.load %arg10[%c0_31, %c0_32] : memref<16x32xf32, #tpu.memory_space<vmem>>, vector<16x32xf32>
      tpu.vector_store %arg10[%c0_31, %c0_32], %52 {strides = array<i32>} : memref<16x32xf32, #tpu.memory_space<vmem>>, vector<16x32xf32>,
    } else {
    }
    return
  }
  func.func @transform_0(%arg0: i32, %arg1: i32) -> (i32, i32) {
    %c0_i32 = arith.constant 0 : i32
    %c0_i32_0 = arith.constant 0 : i32
    return %arg0, %c0_i32 : i32, i32
  }
  func.func @transform_1(%arg0: i32, %arg1: i32) -> (i32, i32) {
    %c0_i32 = arith.constant 0 : i32
    %c0_i32_0 = arith.constant 0 : i32
    return %c0_i32, %arg1 : i32, i32
  }
  func.func @transform_2(%arg0: i32, %arg1: i32) -> (i32, i32) {
    %c0_i32 = arith.constant 0 : i32
    %c0_i32_0 = arith.constant 0 : i32
    return %c0_i32, %arg1 : i32, i32
  }
  func.func @transform_3(%arg0: i32, %arg1: i32) -> (i32, i32) {
    %c0_i32 = arith.constant 0 : i32
    %c0_i32_0 = arith.constant 0 : i32
    return %arg1, %c0_i32 : i32, i32
  }
  func.func @transform_4(%arg0: i32, %arg1: i32) -> (i32, i32) {
    %c0_i32 = arith.constant 0 : i32
    %c0_i32_0 = arith.constant 0 : i32
    %c0_i32_1 = arith.constant 0 : i32
    return %c0_i32, %c0_i32_0 : i32, i32
  }
  func.func @transform_5(%arg0: i32, %arg1: i32) -> (i32, i32) {
    %c0_i32 = arith.constant 0 : i32
    %c0_i32_0 = arith.constant 0 : i32
    return %arg0, %c0_i32 : i32, i32
  }
  func.func @transform_6(%arg0: i32, %arg1: i32) -> (i32, i32) {
    %c0_i32 = arith.constant 0 : i32
    %c0_i32_0 = arith.constant 0 : i32
    %c0_i32_1 = arith.constant 0 : i32
    return %c0_i32, %c0_i32_0 : i32, i32
  }
  func.func @transform_7(%arg0: i32, %arg1: i32) -> (i32, i32) {
    %c0_i32 = arith.constant 0 : i32
    %c0_i32_0 = arith.constant 0 : i32
    %c0_i32_1 = arith.constant 0 : i32
    return %c0_i32, %c0_i32_0 : i32, i32
  }
  func.func @transform_8(%arg0: i32, %arg1: i32) -> (i32, i32) {
    %c0_i32 = arith.constant 0 : i32
    %c0_i32_0 = arith.constant 0 : i32
    return %arg0, %c0_i32 : i32, i32
  }
}

</mosaic_0001>

<bundles_post_ra>
// kernel: transformer_decoder_layer.8
= control target key start
LH: loop header
LB: loop body
LE: loop exit
PB: predicated region body
PF: predicated region fallthrough
CT: control target
= control target key end

     0   :  { %vm19_vm0 = vcmask 785408   ;;  %v145_v0 = vmov 0.0   ;;  %vm146_vm1 = vmmov 0   ;;  %vm43_vm2 = vcmask 261120   ;;  %s192_s1 = inlined_call_operand.vmem [shape: bf16[32,96], index: 1, kind: input, shape index: {}]   ;;  %s193_s0 = inlined_call_operand.vmem [shape: f32[16,32], index: 0, kind: input, shape index: {}]   ;;  %s194_s2 = inlined_call_operand.vmem [shape: f32[1,96], index: 2, kind: input, shape index: {}]   ;;  %s195_s3 = inlined_call_operand.vmem [shape: bf16[16,96], index: 3, kind: output, shape index: {}]  }
   0x1   :  { %133 = vmatprep.subr.bf16.mxu0 %v145_v0  ;;  %v143_v1 = vld [vmem:[%s192_s1] sm:$0xff]   ;;  %137 = vmatprep.mubr.msk.bf16.mxu0 %vm146_vm1, %v145_v0  ;;  %20 = vst.msk [vmem:[#allocation2] sm:$0xff] %vm19_vm0, %v145_v0  ;;  %21 = vst.msk [vmem:[#allocation2 + $0x8] sm:$0xff] %vm19_vm0, %v145_v0  ;;  %v144_v2 = vld [vmem:[%s192_s1 + $0x8] sm:$0xff]   ;;  %vm115_vm3 = vcmask 781312  }
   0x2   :  { %134 = vmatpush3.bf16.msra.mxu0 %v143_v1  ;;  %v24_v3 = vld [vmem:[%s193_s0] sm:$0xff]  ;;  %v25_v4 = vld [vmem:[%s193_s0 + $0x8] sm:$0xff] }
   0x3   :  { %135 = vmatprep.subr.bf16.mxu0 %v145_v0  ;;  %v26_v5 = vpack.c.bf16 %v25_v4, %v24_v3  ;;  %v125_v14 = vld [vmem:[%s194_s2] ss:$0 sm:$0xff] }
   0x6   :  { %136 = vmatpush3.bf16.msra.mxu0 %v144_v2 }
   0x8   :  { %v22_v6 = vld [vmem:[#allocation2] sm:$0xff]  ;;  %v23_v8 = vld [vmem:[#allocation2 + $0x8] sm:$0xff] }
   0x9   :  { %138 = vmatmul.mubr.msk.bf16.vlgmr.msra.gmra.mrb[0].mxu0 %vm43_vm2, %v26_v5 }
  0xdc   :  { %v81_v7 = vpop.f32.mrb[0].mxu0 }
  0xdd   :  { %v88_v9 = vadd.f32 %v81_v7, %v22_v6  ;;  %v139_v10 = vpop.f32.mrb[1].mxu0 }
  0xde   :  { %v84_v11 = vpop.f32.mrb[2].mxu0 }
  0xdf   :  { %91 = vst.msk [vmem:[#allocation2] sm:$0xff] %vm19_vm0, %v88_v9  ;;  %v89_v12 = vadd.f32 %v84_v11, %v23_v8  ;;  %v140_v13 = vpop.f32.mrb[3].mxu0 }
  0xe1   :  { %92 = vst.msk [vmem:[#allocation2 + $0x8] sm:$0xff] %vm19_vm0, %v89_v12 }
  0xe6   :  { %v96_v15 = vld [vmem:[#allocation2] sm:$0xff] }
  0xe7   :  { %v105_v16 = vadd.f32 %v125_v14, %v96_v15 }
  0xe8   :  { %v97_v17 = vld [vmem:[#allocation2 + $0x8] sm:$0xff] }
  0xe9   :  { %v128_v18 = vpack.c.bf16 %v105_v16, %v105_v16  ;;  %v106_v19 = vadd.f32 %v125_v14, %v97_v17 }
  0xeb   :  { %116 = vst.msk [vmem:[%s195_s3] sm:$0xf] %vm115_vm3, %v128_v18  ;;  %v129_v20 = vpack.c.bf16 %v106_v19, %v106_v19 }
  0xed   :  { %117 = vst.msk [vmem:[%s195_s3 + $0x4] sm:$0xf] %vm115_vm3, %v129_v20 }

// kernel: transformer_decoder_layer.11
= control target key start
LH: loop header
LB: loop body
LE: loop exit
PB: predicated region body
PF: predicated region fallthrough
CT: control target
= control target key end

     0   :  { %vm19_vm0 = vcmask 261120   ;;  %v144_v0 = vmov 0.0   ;;  %vm145_vm1 = vmmov 0   ;;  %vm114_vm2 = vcmask 257024   ;;  %s192_s1 = inlined_call_operand.vmem [shape: bf16[32,32], index: 1, kind: input, shape index: {}]   ;;  %s193_s0 = inlined_call_operand.vmem [shape: f32[16,32], index: 0, kind: input, shape index: {}]   ;;  %s194_s2 = inlined_call_operand.vmem [shape: f32[1,32], index: 2, kind: input, shape index: {}]   ;;  %s195_s3 = inlined_call_operand.vmem [shape: bf16[16,32], index: 3, kind: output, shape index: {}]  }
   0x1   :  { %132 = vmatprep.subr.bf16.mxu0 %v144_v0  ;;  %v142_v1 = vld [vmem:[%s192_s1] sm:$0xff]   ;;  %136 = vmatprep.mubr.msk.bf16.mxu0 %vm145_vm1, %v144_v0  ;;  %20 = vst.msk [vmem:[#allocation2] sm:$0xff] %vm19_vm0, %v144_v0  ;;  %21 = vst.msk [vmem:[#allocation2 + $0x8] sm:$0xff] %vm19_vm0, %v144_v0  ;;  %v143_v2 = vld [vmem:[%s192_s1 + $0x8] sm:$0xff]  }
   0x2   :  { %133 = vmatpush3.bf16.msra.mxu0 %v142_v1  ;;  %v24_v3 = vld [vmem:[%s193_s0] sm:$0xff]  ;;  %v25_v4 = vld [vmem:[%s193_s0 + $0x8] sm:$0xff] }
   0x3   :  { %134 = vmatprep.subr.bf16.mxu0 %v144_v0  ;;  %v26_v5 = vpack.c.bf16 %v25_v4, %v24_v3  ;;  %v124_v14 = vld [vmem:[%s194_s2] ss:$0 sm:$0xff] }
   0x6   :  { %135 = vmatpush3.bf16.msra.mxu0 %v143_v2 }
   0x8   :  { %v22_v6 = vld [vmem:[#allocation2] sm:$0xff]  ;;  %v23_v8 = vld [vmem:[#allocation2 + $0x8] sm:$0xff] }
   0x9   :  { %137 = vmatmul.mubr.msk.bf16.vlgmr.msra.gmra.mrb[0].mxu0 %vm19_vm0, %v26_v5 }
  0xdc   :  { %v81_v7 = vpop.f32.mrb[0].mxu0 }
  0xdd   :  { %v88_v9 = vadd.f32 %v81_v7, %v22_v6  ;;  %v138_v10 = vpop.f32.mrb[1].mxu0 }
  0xde   :  { %v84_v11 = vpop.f32.mrb[2].mxu0 }
  0xdf   :  { %90 = vst.msk [vmem:[#allocation2] sm:$0xff] %vm19_vm0, %v88_v9  ;;  %v89_v12 = vadd.f32 %v84_v11, %v23_v8  ;;  %v139_v13 = vpop.f32.mrb[3].mxu0 }
  0xe1   :  { %91 = vst.msk [vmem:[#allocation2 + $0x8] sm:$0xff] %vm19_vm0, %v89_v12 }
  0xe6   :  { %v95_v15 = vld [vmem:[#allocation2] sm:$0xff] }
  0xe7   :  { %v104_v16 = vadd.f32 %v124_v14, %v95_v15 }
  0xe8   :  { %v96_v17 = vld [vmem:[#allocation2 + $0x8] sm:$0xff] }
  0xe9   :  { %v127_v18 = vpack.c.bf16 %v104_v16, %v104_v16  ;;  %v105_v19 = vadd.f32 %v124_v14, %v96_v17 }
  0xeb   :  { %115 = vst.msk [vmem:[%s195_s3] sm:$0xf] %vm114_vm2, %v127_v18  ;;  %v128_v20 = vpack.c.bf16 %v105_v19, %v105_v19 }
  0xed   :  { %116 = vst.msk [vmem:[%s195_s3 + $0x4] sm:$0xf] %vm114_vm2, %v128_v20 }

// kernel: transformer_decoder_layer.10
= control target key start
LH: loop header
LB: loop body
LE: loop exit
PB: predicated region body
PF: predicated region fallthrough
CT: control target
= control target key end

     0   :  { %vm28_vm0 = vcmask 261120   ;;  %v201_v0 = vmov 0.0   ;;  %vm202_vm1 = vmmov 0   ;;  %s279_s1 = inlined_call_operand.vmem [shape: bf16[32,32], index: 1, kind: input, shape index: {}]   ;;  %s280_s0 = inlined_call_operand.vmem [shape: bf16[16,32], index: 0, kind: input, shape index: {}]   ;;  %s281_s2 = inlined_call_operand.vmem [shape: f32[1,32], index: 2, kind: input, shape index: {}]   ;;  %s282_s3 = inlined_call_operand.vmem [shape: f32[16,32], index: 3, kind: input, shape index: {}]   ;;  %s283_s4 = inlined_call_operand.vmem [shape: f32[1,32], index: 4, kind: input, shape index: {}]   ;;  %s284_s5 = inlined_call_operand.vmem [shape: f32[1,32], index: 5, kind: input, shape index: {}]   ;;  %s285_s6 = inlined_call_operand.vmem [shape: f32[16,32], index: 6, kind: output, shape index: {}]  }
   0x1   :  { %184 = vmatprep.subr.bf16.mxu0 %v201_v0  ;;  %v194_v1 = vld [vmem:[%s279_s1] sm:$0xff]   ;;  %188 = vmatprep.mubr.msk.bf16.mxu0 %vm202_vm1, %v201_v0  ;;  %29 = vst.msk [vmem:[#allocation2] sm:$0xff] %vm28_vm0, %v201_v0  ;;  %30 = vst.msk [vmem:[#allocation2 + $0x8] sm:$0xff] %vm28_vm0, %v201_v0  ;;  %v195_v2 = vld [vmem:[%s279_s1 + $0x8] sm:$0xff]  }
   0x2   :  { %185 = vmatpush3.bf16.msra.mxu0 %v194_v1  ;;  %v196_v3 = vld [vmem:[%s280_s0] sm:$0xff]   ;;  %v120_v17 = vld [vmem:[%s282_s3 + $0x8] sm:$0xff] }
   0x3   :  { %186 = vmatprep.subr.bf16.mxu0 %v201_v0  ;;  %v178_v12 = vld [vmem:[%s281_s2] ss:$0 sm:$0xff] }
   0x4   :  { %v119_v14 = vld [vmem:[%s282_s3] sm:$0xff] }
   0x5   :  { %v179_v40 = vld [vmem:[%s283_s4] ss:$0 sm:$0xff] }
   0x6   :  { %187 = vmatpush3.bf16.msra.mxu0 %v195_v2  ;;  %v180_v42 = vld [vmem:[%s284_s5] ss:$0 sm:$0xff] }
   0x8   :  { %v31_v4 = vld [vmem:[#allocation2] sm:$0xff]  ;;  %v32_v6 = vld [vmem:[#allocation2 + $0x8] sm:$0xff] }
   0x9   :  { %189 = vmatmul.mubr.msk.bf16.vlgmr.msra.gmra.mrb[0].mxu0 %vm28_vm0, %v196_v3 }
  0xdc   :  { %v94_v5 = vpop.f32.mrb[0].mxu0 }
  0xdd   :  { %v101_v7 = vadd.f32 %v94_v5, %v31_v4  ;;  %v190_v8 = vpop.f32.mrb[1].mxu0 }
  0xde   :  { %v97_v9 = vpop.f32.mrb[2].mxu0 }
  0xdf   :  { %103 = vst.msk [vmem:[#allocation2] sm:$0xff] %vm28_vm0, %v101_v7  ;;  %v102_v10 = vadd.f32 %v97_v9, %v32_v6  ;;  %v191_v11 = vpop.f32.mrb[3].mxu0 }
  0xe1   :  { %104 = vst.msk [vmem:[#allocation2 + $0x8] sm:$0xff] %vm28_vm0, %v102_v10 }
  0xe6   :  { %v108_v13 = vld [vmem:[#allocation2] sm:$0xff] }
  0xe7   :  { %v117_v15 = vadd.f32 %v178_v12, %v108_v13 }
  0xe8   :  { %v109_v16 = vld [vmem:[#allocation2 + $0x8] sm:$0xff] }
  0xe9   :  { %v121_v18 = vadd.f32 %v119_v14, %v117_v15  ;;  %v118_v19 = vadd.f32 %v178_v12, %v109_v16 }
  0xeb   :  { %v123_v20 = vsel %vm28_vm0, %v121_v18, 0.0  ;;  %v122_v21 = vadd.f32 %v120_v17, %v118_v19 }
  0xec   :  { %124 = vadd.xlane.f32.xlu0 %v123_v20 }
  0xed   :  { %v126_v22 = vsel %vm28_vm0, %v122_v21, 0.0 }
  0xf0   :  { %127 = vadd.xlane.f32.xlu0 %v126_v22 }
 0x179   :  { %v125_v23 = vpop.xlane.xlu0 %124 }
 0x17a   :  { %v130_v24 = vmul.f32 0.03125, %v125_v23 }
 0x17c   :  { %v132_v25 = vsub.f32 %v121_v18, %v130_v24 }
 0x17d   :  { %v128_v26 = vpop.xlane.xlu0 %127 }
 0x17e   :  { %v131_v27 = vmul.f32 0.03125, %v128_v26  ;;  %v134_v28 = vmul.f32 %v132_v25, %v132_v25 }
 0x180   :  { %v133_v29 = vsub.f32 %v122_v21, %v131_v27  ;;  %v136_v30 = vsel %vm28_vm0, %v134_v28, 0.0 }
 0x181   :  { %137 = vadd.xlane.f32.xlu1 %v136_v30 }
 0x182   :  { %v135_v31 = vmul.f32 %v133_v29, %v133_v29 }
 0x184   :  { %v139_v32 = vsel %vm28_vm0, %v135_v31, 0.0 }
 0x185   :  { %140 = vadd.xlane.f32.xlu1 %v139_v32 }
 0x20e   :  { %v138_v33 = vpop.xlane.xlu1 %137 }
 0x20f   :  { %v142_v34 = vmul.f32 0.03125, %v138_v33 }
 0x211   :  { %v144_v35 = vadd.f32 1e-05, %v142_v34 }
 0x212   :  { %v141_v36 = vpop.xlane.xlu1 %140 }
 0x213   :  { %197 = vrsqrt.f32 %v144_v35  ;;  %v143_v37 = vmul.f32 0.03125, %v141_v36 }
 0x215   :  { %v145_v38 = vadd.f32 1e-05, %v143_v37 }
 0x217   :  { %199 = vrsqrt.f32 %v145_v38 }
 0x21d   :  { %v198_v39 = vpop.eup %197 }
 0x21e   :  { %v148_v41 = vmul.f32 %v198_v39, %v132_v25 }
 0x220   :  { %v157_v43 = vmul.f32 %v179_v40, %v148_v41 }
 0x221   :  { %v200_v44 = vpop.eup %199 }
 0x222   :  { %v166_v45 = vadd.f32 %v180_v42, %v157_v43  ;;  %v149_v46 = vmul.f32 %v200_v44, %v133_v29 }
 0x224   :  { %168 = vst.msk [vmem:[%s285_s6] sm:$0xff] %vm28_vm0, %v166_v45  ;;  %v158_v47 = vmul.f32 %v179_v40, %v149_v46 }
 0x226   :  { %v167_v48 = vadd.f32 %v180_v42, %v158_v47 }
 0x228   :  { %169 = vst.msk [vmem:[%s285_s6 + $0x8] sm:$0xff] %vm28_vm0, %v167_v48 }

// kernel: transformer_decoder_layer.9
= control target key start
LH: loop header
LB: loop body
LE: loop exit
PB: predicated region body
PF: predicated region fallthrough
CT: control target
= control target key end

     0   :  { %s1258_s15 = smov 0   ;;  %s1260_s16 = smov 0   ;;  %s1447_s0 = inlined_call_operand.vmem [shape: bf16[2,4,8,8], index: 0, kind: input, shape index: {}]   ;;  %s1448_s1 = inlined_call_operand.vmem [shape: bf16[2,4,8,8], index: 1, kind: input, shape index: {}]   ;;  %s1449_s2 = inlined_call_operand.vmem [shape: bf16[2,4,8,8], index: 2, kind: input, shape index: {}]   ;;  %s1450_s3 = inlined_call_operand.vmem [shape: f32[8,8], index: 3, kind: input, shape index: {}]   ;;  %s1451_s4 = inlined_call_operand.vmem [shape: bf16[2,4,8,8], index: 4, kind: output, shape index: {}]  }
   0x1   :  { %s1262_s17 = smov 0  }
   0x2 LB: > { %s33_s18 = sadd.s32 1, %s1223_s16  ;;  %p1064_p0 = scmp.ge.s32.totalorder %s1227_s17, 1  ;;  %s1227_s17 = sphi %s1262_s17, %s14_s17   ;;  %s1223_s16 = sphi %s1260_s16, %s1453_s16   ;;  %s1219_s15 = sphi %s1258_s15, %s1452_s15  }
   0x3   : > { %p35_p1 = scmp.ge.s32.totalorder %s33_s18, 2  ;;  %p232_p2 = scmp.lt.s32.totalorder %s1227_s17, 3 }
   0x5   : > { %s1455_s18 = smov (%p35_p1, %s33_s18), 0  ;;  %p233_p3 = pnand %p1064_p0, %p232_p2 }
   0x6   : > { %p287_p4 = scmp.lt.s32.totalorder (!%p233_p3), %s1219_s15, 1  ;;  %vm341_vm0 = vcmask (!%p233_p3), 64512   ;;  %v1229_v0 = vmov (!%p233_p3), 0.0   ;;  %vm1230_vm1 = vmmov (!%p233_p3), 0   ;;  %vm332_vm2 = vcmask (!%p233_p3), 7168   ;;  %v362_v18 = vld [vmem:[%s1450_s3] sm:$0xff] (!%p233_p3) }
   0x7   : > { %236 = sbr.rel (%p233_p3) target bundleno = 837 (0x345), region = 36  ;;  %1103 = vmatprep.subr.bf16.mxu0 (!%p233_p3), %v1229_v0  ;;  %342 = vst.msk [vmem:[#allocation4] sm:$0xff] (!%p233_p3), %vm341_vm0, %v1229_v0  ;;  %343 = vst.msk [vmem:[#allocation4 + $0x8] sm:$0xff] (!%p233_p3), %vm341_vm0, %v1229_v0  ;;  %1109 = vmatprep.subr.bf16.mxu1 (!%p233_p3), %v1229_v0  ;;  %v1231_v17 = vmov (!%p233_p3), -1e+30   ;;  %v1232_v43 = vmov (!%p233_p3), 0  }
   0x8   : > { %344 = vst.msk [vmem:[#allocation4 + $0x10] sm:$0xff] (!%p233_p3), %vm341_vm0, %v1229_v0  ;;  %345 = vst.msk [vmem:[#allocation4 + $0x18] sm:$0xff] (!%p233_p3), %vm341_vm0, %v1229_v0  ;;  %1105 = vmatprep.mubr.msk.bf16.mxu0 (!%p233_p3), %vm1230_vm1, %v1229_v0  ;;  %1111 = vmatprep.mubr.msk.bf16.mxu1 (!%p233_p3), %vm1230_vm1, %v1229_v0  ;;  %vm676_vm3 = vcmask (!%p233_p3), 1043456   ;;  %vm913_vm4 = vcmask (!%p233_p3), 60416  }
   0x9   : > { %333 = vst.msk [vmem:[#allocation2] sm:$0xff] (!%p233_p3), %vm332_vm2, %v1231_v17  ;;  %334 = vst.msk [vmem:[#allocation2 + $0x8] sm:$0xff] (!%p233_p3), %vm332_vm2, %v1231_v17  ;;  %1179 = vset.pattern.permute.xlu0 (!%p233_p3), %v1232_v43  ;;  %1180 = vset.pattern.permute.xlu1 (!%p233_p3), %v1232_v43 }
   0xa   : > { %335 = vst.msk [vmem:[#allocation2 + $0x10] sm:$0xff] (!%p233_p3), %vm332_vm2, %v1231_v17  ;;  %336 = vst.msk [vmem:[#allocation2 + $0x18] sm:$0xff] (!%p233_p3), %vm332_vm2, %v1231_v17 }
   0xb   : > { %337 = vst.msk [vmem:[#allocation3] sm:$0xff] (!%p233_p3), %vm332_vm2, %v1229_v0  ;;  %338 = vst.msk [vmem:[#allocation3 + $0x8] sm:$0xff] (!%p233_p3), %vm332_vm2, %v1229_v0 }
   0xc   : > { %339 = vst.msk [vmem:[#allocation3 + $0x10] sm:$0xff] (!%p233_p3), %vm332_vm2, %v1229_v0  ;;  %340 = vst.msk [vmem:[#allocation3 + $0x18] sm:$0xff] (!%p233_p3), %vm332_vm2, %v1229_v0 }
   0xe   : > { %s1457_s15 = smov (!%p287_p4, %s1219_s15), 1 }
   0xf   : > { %s1290_s19 = sshll.u32 %s1457_s15, 4 }
  0x10   : > { %s302_s22 = scalar_lea.vmem %s1448_s1, %s1290_s19  ;;  %s294_s25 = scalar_lea.vmem %s1447_s0, %s1290_s19  ;;  %v1351_v44 = vld [vmem:[#allocation2] sm:$0xff]  ;;  %v1356_v47 = vld [vmem:[#allocation2 + $0x8] sm:$0xff] }
  0x11   : > { %v354_v1 = vld [vmem:[%s302_s22] sm:$0xf]  ;;  %v355_v2 = vld [vmem:[%s302_s22 + $0x4] sm:$0xf]  ;;  %v356_v7 = vld [vmem:[%s302_s22 + $0x8] sm:$0xf]  ;;  %s310_s30 = scalar_lea.vmem %s1449_s2, %s1290_s19  ;;  %s325_s7 = scalar_lea.vmem %s1451_s4, %s1290_s19 }
  0x12   : > { %v368_v3 = vsel %vm341_vm0, %v354_v1, 0  ;;  %v414_v4 = vsel %vm341_vm0, %v355_v2, 0  ;;  %v346_v5 = vld [vmem:[%s294_s25] sm:$0xf]  ;;  %v347_v6 = vld [vmem:[%s294_s25 + $0x4] sm:$0xf] }
  0x13   : > { %1104 = vmatpush3.bf16.xpose.msra.mxu0 %v368_v3  ;;  %1110 = vmatpush3.bf16.xpose.msra.mxu1 %v414_v4  ;;  %v357_v8 = vld [vmem:[%s302_s22 + $0xc] sm:$0xf]  ;;  %v350_v9 = vmul.bf16 1052065461, %v346_v5  ;;  %v351_v10 = vmul.bf16 1052065461, %v347_v6 }
  0x14   : > { %1115 = vmatprep.subr.bf16.mxu0 %v1229_v0  ;;  %1121 = vmatprep.subr.bf16.mxu1 %v1229_v0  ;;  %v460_v11 = vsel %vm341_vm0, %v356_v7, 0  ;;  %v506_v12 = vsel %vm341_vm0, %v357_v8, 0  ;;  %v348_v13 = vld [vmem:[%s294_s25 + $0x8] sm:$0xf]  ;;  %v349_v14 = vld [vmem:[%s294_s25 + $0xc] sm:$0xf] }
  0x15   : > { %v352_v15 = vmul.bf16 1052065461, %v348_v13  ;;  %v353_v16 = vmul.bf16 1052065461, %v349_v14  ;;  %v1366_v51 = vld [vmem:[#allocation2 + $0x10] sm:$0xff]  ;;  %v1376_v55 = vld [vmem:[#allocation2 + $0x18] sm:$0xff] }
  0x16   : > { %v358_v60 = vld [vmem:[%s310_s30] sm:$0xf]  ;;  %v359_v62 = vld [vmem:[%s310_s30 + $0x4] sm:$0xf]  ;;  %v360_v1 = vld [vmem:[%s310_s30 + $0x8] sm:$0xf] }
  0x17   : > { %v678_v61 = vsel %vm676_vm3, %v358_v60, 0  ;;  %v724_v63 = vsel %vm676_vm3, %v359_v62, 0  ;;  %v770_v2 = vsel %vm676_vm3, %v360_v1, 0  ;;  %v361_v3 = vld [vmem:[%s310_s30 + $0xc] sm:$0xf]  ;;  %v614_v43 = vld [vmem:[#allocation3 + $0x10] sm:$0xff] }
  0x18   : > { %v816_v4 = vsel %vm676_vm3, %v361_v3, 0  ;;  %v641_v60 = vld [vmem:[#allocation4] sm:$0xff] }
  0x1a   : > { %1106 = vmatmul.mubr.msk.bf16.vlgmr.msra.gmra.mrb[0].mxu0 %vm341_vm0, %v350_v9  ;;  %1112 = vmatmul.mubr.msk.bf16.vlgmr.msra.gmra.mrb[0].mxu1 %vm341_vm0, %v351_v10 }
  0x1b   : > { %1116 = vmatpush3.bf16.xpose.msra.mxu0 %v460_v11  ;;  %1122 = vmatpush3.bf16.xpose.msra.mxu1 %v506_v12 }
  0x1c   : > { %1117 = vmatprep.mubr.msk.bf16.mxu0 %vm1230_vm1, %v1229_v0  ;;  %1123 = vmatprep.mubr.msk.bf16.mxu1 %vm1230_vm1, %v1229_v0 }
  0x1d   : > { %1127 = vmatprep.subr.bf16.mxu0 %v1229_v0  ;;  %1133 = vmatprep.subr.bf16.mxu1 %v1229_v0 }
  0x22   : > { %1118 = vmatmul.mubr.msk.bf16.vlgmr.msra.gmra.mrb[4].mxu0 %vm341_vm0, %v352_v15  ;;  %1124 = vmatmul.mubr.msk.bf16.vlgmr.msra.gmra.mrb[4].mxu1 %vm341_vm0, %v353_v16 }
  0x23   : > { %1129 = vmatprep.mubr.msk.bf16.mxu0 %vm1230_vm1, %v1229_v0  ;;  %1135 = vmatprep.mubr.msk.bf16.mxu1 %vm1230_vm1, %v1229_v0 }
  0x24   : > { %1128 = vmatpush3.bf16.msra.mxu0 %v678_v61  ;;  %1134 = vmatpush3.bf16.msra.mxu1 %v724_v63  ;;  %v642_v63 = vld [vmem:[#allocation4 + $0x8] sm:$0xff] }
  0x25   : > { %1139 = vmatprep.subr.bf16.mxu0 %v1229_v0  ;;  %1145 = vmatprep.subr.bf16.mxu1 %v1229_v0 }
  0xed   : > { %v404_v19 = vpop.f32.mrb[0].mxu0  ;;  %v450_v20 = vpop.f32.mrb[0].mxu1 }
  0xee   : > { %v1335_v21 = vadd.f32 %v404_v19, %v362_v18  ;;  %v1107_v22 = vpop.f32.mrb[1].mxu0  ;;  %v1337_v23 = vadd.f32 %v450_v20, %v362_v18  ;;  %v1113_v24 = vpop.f32.mrb[1].mxu1 }
  0xef   : > { %v407_v25 = vpop.f32.mrb[2].mxu0  ;;  %v453_v26 = vpop.f32.mrb[2].mxu1 }
  0xf0   : > { %v1108_v27 = vpop.f32.mrb[3].mxu0  ;;  %v552_v28 = vsel %vm341_vm0, %v1335_v21, -inf  ;;  %v1114_v29 = vpop.f32.mrb[3].mxu1  ;;  %v555_v30 = vsel %vm341_vm0, %v1337_v23, -inf }
  0xf1   : > { %553 = vmax.xlane.f32.xlu0 %v552_v28 }
  0xf5   : > { %556 = vmax.xlane.f32.xlu0 %v555_v30  ;;  %v496_v31 = vpop.f32.mrb[4].mxu0  ;;  %v542_v32 = vpop.f32.mrb[4].mxu1 }
  0xf6   : > { %v1343_v33 = vadd.f32 %v496_v31, %v362_v18  ;;  %v1119_v34 = vpop.f32.mrb[5].mxu0  ;;  %v1345_v35 = vadd.f32 %v542_v32, %v362_v18  ;;  %v1125_v36 = vpop.f32.mrb[5].mxu1 }
  0xf7   : > { %v499_v37 = vpop.f32.mrb[6].mxu0  ;;  %v545_v38 = vpop.f32.mrb[6].mxu1  ;;  %v612_v36 = vld [vmem:[#allocation3] sm:$0xff] }
  0xf8   : > { %v1120_v39 = vpop.f32.mrb[7].mxu0  ;;  %v558_v40 = vsel %vm341_vm0, %v1343_v33, -inf  ;;  %v1126_v41 = vpop.f32.mrb[7].mxu1  ;;  %v561_v42 = vsel %vm341_vm0, %v1345_v35, -inf }
  0xf9   : > { %559 = vmax.xlane.f32.xlu1 %v558_v40  ;;  %v613_v39 = vld [vmem:[#allocation3 + $0x8] sm:$0xff] }
  0xfd   : > { %562 = vmax.xlane.f32.xlu1 %v561_v42 }
 0x17e   : > { %v554_v45 = vpop.xlane.xlu0 %553 }
 0x17f   : > { %v1354_v46 = vmax.f32 %v1351_v44, %v554_v45 }
 0x181   : > { %v568_v48 = vsub.f32 %v1351_v44, %v1354_v46  ;;  %866 = vst.msk [vmem:[#allocation2] sm:$0xff] %vm332_vm2, %v1354_v46  ;;  %582 = vperm.xlu0 %1179, %v1354_v46  }
 0x182   : > { %v557_v49 = vpop.xlane.xlu0 %556 }
 0x183   : > { %v1364_v50 = vmax.f32 %v1356_v47, %v557_v49 }
 0x185   : > { %v569_v52 = vsub.f32 %v1356_v47, %v1364_v50  ;;  %867 = vst.msk [vmem:[#allocation2 + $0x8] sm:$0xff] %vm332_vm2, %v1364_v50  ;;  %587 = vperm.xlu1 %1180, %v1364_v50   ;;  %v615_v47 = vld [vmem:[#allocation3 + $0x18] sm:$0xff] }
 0x186   : > { %v560_v53 = vpop.xlane.xlu1 %559 }
 0x187   : > { %v1374_v54 = vmax.f32 %v1366_v51, %v560_v53  ;;  %v574_v27 = vmul.f32 1.442695, %v569_v52 }
 0x189   : > { %v570_v56 = vsub.f32 %v1366_v51, %v1374_v54  ;;  %868 = vst.msk [vmem:[#allocation2 + $0x10] sm:$0xff] %vm332_vm2, %v1374_v54  ;;  %592 = vperm.xlu1 %1180, %v1374_v54  }
 0x18a   : > { %v563_v57 = vpop.xlane.xlu1 %562 }
 0x18b   : > { %v1384_v58 = vmax.f32 %v1376_v55, %v563_v57  ;;  %v576_v30 = vmul.f32 1.442695, %v570_v56 }
 0x18d   : > { %v571_v59 = vsub.f32 %v1376_v55, %v1384_v58  ;;  %869 = vst.msk [vmem:[#allocation2 + $0x18] sm:$0xff] %vm332_vm2, %v1384_v58  ;;  %597 = vperm.xlu1 %1180, %v1384_v58  }
 0x18f   : > { %v578_v31 = vmul.f32 1.442695, %v571_v59 }
 0x200   : > { %v583_v5 = vpop.permute.xlu0 %582 }
 0x201   : > { %v600_v6 = vsub.f32 %v1335_v21, %v583_v5 }
 0x203   : > { %v604_v7 = vmul.f32 1.442695, %v600_v6 }
 0x204   : > { %v588_v8 = vpop.permute.xlu1 %587 }
 0x205   : > { %1181 = vpow2.f32 %v604_v7  ;;  %v601_v9 = vsub.f32 %v1337_v23, %v588_v8 }
 0x207   : > { %v606_v10 = vmul.f32 1.442695, %v601_v9  ;;  %v643_v9 = vld [vmem:[#allocation4 + $0x10] sm:$0xff] }
 0x208   : > { %v593_v11 = vpop.permute.xlu1 %592 }
 0x209   : > { %1183 = vpow2.f32 %v606_v10  ;;  %v602_v12 = vsub.f32 %v1343_v33, %v593_v11 }
 0x20b   : > { %v608_v13 = vmul.f32 1.442695, %v602_v12 }
 0x20c   : > { %v598_v14 = vpop.permute.xlu1 %597 }
 0x20d   : > { %1185 = vpow2.f32 %v608_v13  ;;  %v603_v15 = vsub.f32 %v1345_v35, %v598_v14 }
 0x20f   : > { %v1182_v16 = vpop.eup %1181  ;;  %v610_v17 = vmul.f32 1.442695, %v603_v15 }
 0x210   : > { %v620_v18 = vsel %vm341_vm0, %v1182_v16, 0.0  ;;  %v669_v19 = vpack.c.bf16 %v1182_v16, %v1182_v16  ;;  %v644_v16 = vld [vmem:[#allocation4 + $0x18] sm:$0xff] }
 0x211   : > { %1187 = vpow2.f32 %v610_v17  ;;  %621 = vadd.xlane.f32.xlu1 %v620_v18 }
 0x212   : > { %1130 = vmatmul.mubr.msk.bf16.vlgmr.msra.gmra.mrb[8].mxu0 %vm341_vm0, %v669_v19  ;;  %1189 = vpow2.f32 %v574_v27 }
 0x213   : > { %v1184_v20 = vpop.eup %1183  ;;  %1140 = vmatpush3.bf16.msra.mxu0 %v770_v2  ;;  %1141 = vmatprep.mubr.msk.bf16.mxu0 %vm1230_vm1, %v1229_v0 }
 0x214   : > { %v623_v21 = vsel %vm341_vm0, %v1184_v20, 0.0  ;;  %v670_v22 = vpack.c.bf16 %v1184_v20, %v1184_v20 }
 0x215   : > { %624 = vadd.xlane.f32.xlu0 %v623_v21 }
 0x216   : > { %1136 = vmatmul.mubr.msk.bf16.vlgmr.msra.gmra.mrb[8].mxu1 %vm341_vm0, %v670_v22 }
 0x217   : > { %v1186_v23 = vpop.eup %1185  ;;  %1146 = vmatpush3.bf16.msra.mxu1 %v816_v4  ;;  %1147 = vmatprep.mubr.msk.bf16.mxu1 %vm1230_vm1, %v1229_v0  ;;  %v572_v0 = vmul.f32 1.442695, %v568_v48 }
 0x218   : > { %v626_v24 = vsel %vm341_vm0, %v1186_v23, 0.0  ;;  %v671_v25 = vpack.c.bf16 %v1186_v23, %v1186_v23 }
 0x219   : > { %627 = vadd.xlane.f32.xlu1 %v626_v24  ;;  %1191 = vpow2.f32 %v572_v0 }
 0x21a   : > { %1142 = vmatmul.mubr.msk.bf16.vlgmr.msra.gmra.mrb[12].mxu0 %vm341_vm0, %v671_v25  ;;  %1193 = vpow2.f32 %v576_v30 }
 0x21b   : > { %v1188_v26 = vpop.eup %1187  ;;  %1195 = vpow2.f32 %v578_v31 }
 0x21c   : > { %v629_v28 = vsel %vm341_vm0, %v1188_v26, 0.0  ;;  %v672_v29 = vpack.c.bf16 %v1188_v26, %v1188_v26  ;;  %v1190_v32 = vpop.eup %1189 }
 0x21d   : > { %630 = vadd.xlane.f32.xlu1 %v629_v28  ;;  %v617_v41 = vmul.f32 %v1190_v32, %v613_v39 }
 0x21e   : > { %1148 = vmatmul.mubr.msk.bf16.vlgmr.msra.gmra.mrb[12].mxu1 %vm341_vm0, %v672_v29 }
 0x223   : > { %v1192_v33 = vpop.eup %1191 }
 0x224   : > { %v1194_v34 = vpop.eup %1193  ;;  %v616_v37 = vmul.f32 %v1192_v33, %v612_v36 }
 0x225   : > { %v1196_v35 = vpop.eup %1195  ;;  %v618_v45 = vmul.f32 %v1194_v34, %v614_v43 }
 0x226   : > { %v619_v50 = vmul.f32 %v1196_v35, %v615_v47 }
 0x22b   : > { %652 = vperm.xlu0 %1179, %v1190_v32  }
 0x22e   : > { %647 = vperm.xlu1 %1180, %v1192_v33  }
 0x232   : > { %657 = vperm.xlu1 %1180, %v1194_v34  }
 0x236   : > { %662 = vperm.xlu1 %1180, %v1196_v35  }
 0x29e   : > { %v622_v38 = vpop.xlane.xlu1 %621 }
 0x29f   : > { %v632_v40 = vadd.f32 %v622_v38, %v616_v37 }
 0x2a1   : > { %637 = vst.msk [vmem:[#allocation3] sm:$0xff] %vm332_vm2, %v632_v40 }
 0x2a2   : > { %v625_v42 = vpop.xlane.xlu0 %624 }
 0x2a3   : > { %v633_v44 = vadd.f32 %v625_v42, %v617_v41 }
 0x2a5   : > { %638 = vst.msk [vmem:[#allocation3 + $0x8] sm:$0xff] %vm332_vm2, %v633_v44 }
 0x2a6   : > { %v628_v46 = vpop.xlane.xlu1 %627 }
 0x2a7   : > { %v634_v48 = vadd.f32 %v628_v46, %v618_v45 }
 0x2a8   : > { %v877_v49 = vld [vmem:[#allocation3] sm:$0xff] }
 0x2a9   : > { %639 = vst.msk [vmem:[#allocation3 + $0x10] sm:$0xff] %vm332_vm2, %v634_v48  ;;  %1197 = vrcp.f32 %v877_v49 }
 0x2aa   : > { %v631_v51 = vpop.xlane.xlu1 %630  ;;  %v653_v1 = vpop.permute.xlu0 %652 }
 0x2ab   : > { %v635_v52 = vadd.f32 %v631_v51, %v619_v50  ;;  %v666_v7 = vmul.f32 %v653_v1, %v642_v63 }
 0x2ac   : > { %v878_v53 = vld [vmem:[#allocation3 + $0x8] sm:$0xff] }
 0x2ad   : > { %640 = vst.msk [vmem:[#allocation3 + $0x18] sm:$0xff] %vm332_vm2, %v635_v52  ;;  %1199 = vrcp.f32 %v878_v53 }
 0x2ae   : > { %v648_v61 = vpop.permute.xlu1 %647 }
 0x2af   : > { %v665_v62 = vmul.f32 %v648_v61, %v641_v60 }
 0x2b0   : > { %v879_v54 = vld [vmem:[#allocation3 + $0x10] sm:$0xff] }
 0x2b1   : > { %1201 = vrcp.f32 %v879_v54 }
 0x2b2   : > { %v658_v5 = vpop.permute.xlu1 %657 }
 0x2b3   : > { %v1198_v55 = vpop.eup %1197  ;;  %v667_v14 = vmul.f32 %v658_v5, %v643_v9 }
 0x2b4   : > { %887 = vperm.xlu1 %1180, %v1198_v55   ;;  %v880_v56 = vld [vmem:[#allocation3 + $0x18] sm:$0xff] }
 0x2b5   : > { %1203 = vrcp.f32 %v880_v56 }
 0x2b6   : > { %v663_v17 = vpop.permute.xlu1 %662 }
 0x2b7   : > { %v1200_v57 = vpop.eup %1199  ;;  %v668_v22 = vmul.f32 %v663_v17, %v644_v16 }
 0x2b8   : > { %892 = vperm.xlu0 %1179, %v1200_v57  }
 0x2bb   : > { %v1202_v58 = vpop.eup %1201 }
 0x2bc   : > { %897 = vperm.xlu1 %1180, %v1202_v58  }
 0x2bf   : > { %v1204_v59 = vpop.eup %1203 }
 0x2c0   : > { %902 = vperm.xlu0 %1179, %v1204_v59  }
 0x2e5   : > { %v714_v2 = vpop.f32.mrb[8].mxu0 }
 0x2e6   : > { %v858_v3 = vadd.f32 %v714_v2, %v665_v62  ;;  %v1131_v4 = vpop.f32.mrb[9].mxu0 }
 0x2e7   : > { %v717_v6 = vpop.f32.mrb[10].mxu0 }
 0x2e8   : > { %862 = vst.msk [vmem:[#allocation4] sm:$0xff] %vm341_vm0, %v858_v3  ;;  %v1132_v8 = vpop.f32.mrb[11].mxu0 }
 0x2e9   : > { %v760_v10 = vpop.f32.mrb[8].mxu1 }
 0x2ea   : > { %v859_v11 = vadd.f32 %v760_v10, %v666_v7  ;;  %v1137_v12 = vpop.f32.mrb[9].mxu1 }
 0x2eb   : > { %v763_v13 = vpop.f32.mrb[10].mxu1 }
 0x2ec   : > { %863 = vst.msk [vmem:[#allocation4 + $0x8] sm:$0xff] %vm341_vm0, %v859_v11  ;;  %v1138_v15 = vpop.f32.mrb[11].mxu1 }
 0x2ed   : > { %v806_v18 = vpop.f32.mrb[12].mxu0 }
 0x2ee   : > { %v860_v19 = vadd.f32 %v806_v18, %v667_v14  ;;  %v1143_v20 = vpop.f32.mrb[13].mxu0 }
 0x2ef   : > { %v809_v21 = vpop.f32.mrb[14].mxu0  ;;  %v873_v0 = vld [vmem:[#allocation4] sm:$0xff] }
 0x2f0   : > { %864 = vst.msk [vmem:[#allocation4 + $0x10] sm:$0xff] %vm341_vm0, %v860_v19  ;;  %v1144_v23 = vpop.f32.mrb[15].mxu0 }
 0x2f1   : > { %v852_v24 = vpop.f32.mrb[12].mxu1 }
 0x2f2   : > { %v861_v25 = vadd.f32 %v852_v24, %v668_v22  ;;  %v1149_v26 = vpop.f32.mrb[13].mxu1 }
 0x2f3   : > { %v855_v27 = vpop.f32.mrb[14].mxu1  ;;  %v874_v32 = vld [vmem:[#allocation4 + $0x8] sm:$0xff] }
 0x2f4   : > { %865 = vst.msk [vmem:[#allocation4 + $0x18] sm:$0xff] %vm341_vm0, %v861_v25  ;;  %v1150_v28 = vpop.f32.mrb[15].mxu1 }
 0x2f7   : > { %v875_v37 = vld [vmem:[#allocation4 + $0x10] sm:$0xff] }
 0x2fb   : > { %v876_v41 = vld [vmem:[#allocation4 + $0x18] sm:$0xff] }
 0x333   : > { %v888_v29 = vpop.permute.xlu1 %887 }
 0x334   : > { %v905_v30 = vmul.f32 %v888_v29, %v873_v0 }
 0x336   : > { %v909_v31 = vpack.c.bf16 %v905_v30, %v905_v30 }
 0x337   : > { %v893_v33 = vpop.permute.xlu0 %892 }
 0x338   : > { %914 = vst.msk [vmem:[%s325_s7] sm:$0xf] %vm913_vm4, %v909_v31  ;;  %v906_v34 = vmul.f32 %v893_v33, %v874_v32 }
 0x33a   : > { %v910_v35 = vpack.c.bf16 %v906_v34, %v906_v34 }
 0x33b   : > { %v898_v36 = vpop.permute.xlu1 %897 }
 0x33c   : > { %915 = vst.msk [vmem:[%s325_s7 + $0x4] sm:$0xf] %vm913_vm4, %v910_v35  ;;  %v907_v38 = vmul.f32 %v898_v36, %v875_v37 }
 0x33e   : > { %v911_v39 = vpack.c.bf16 %v907_v38, %v907_v38 }
 0x33f   : > { %v903_v40 = vpop.permute.xlu0 %902 }
 0x340   : > { %916 = vst.msk [vmem:[%s325_s7 + $0x8] sm:$0xf] %vm913_vm4, %v911_v39  ;;  %v908_v42 = vmul.f32 %v903_v40, %v876_v41 }
 0x342   : > { %v912_v43 = vpack.c.bf16 %v908_v42, %v908_v42 }
 0x344   : > { %917 = vst.msk [vmem:[%s325_s7 + $0xc] sm:$0xf] %vm913_vm4, %v912_v43 }
 0x345 PF: > { %s14_s17 = sadd.s32 1, %s1227_s17   ;;  %s1452_s15 = smov %s1223_s16 }
 0x346   : > { %p11_p5 = scmp.ge.s32.totalorder %s14_s17, 4   ;;  %s1453_s16 = smov %s1455_s18 }
 0x348   :  { %13 = sbr.rel (!%p11_p5) target bundleno = 2 (0x2), region = 83 }

// kernel: transformer_decoder_layer.12
= control target key start
LH: loop header
LB: loop body
LE: loop exit
PB: predicated region body
PF: predicated region fallthrough
CT: control target
= control target key end

     0   :  { %vm19_vm0 = vcmask 523264   ;;  %v145_v0 = vmov 0.0   ;;  %vm146_vm1 = vmmov 0   ;;  %vm43_vm2 = vcmask 261120   ;;  %s192_s1 = inlined_call_operand.vmem [shape: bf16[32,64], index: 1, kind: input, shape index: {}]   ;;  %s193_s0 = inlined_call_operand.vmem [shape: f32[16,32], index: 0, kind: input, shape index: {}]   ;;  %s194_s2 = inlined_call_operand.vmem [shape: f32[1,64], index: 2, kind: input, shape index: {}]   ;;  %s195_s3 = inlined_call_operand.vmem [shape: bf16[16,64], index: 3, kind: output, shape index: {}]  }
   0x1   :  { %133 = vmatprep.subr.bf16.mxu0 %v145_v0  ;;  %v143_v1 = vld [vmem:[%s192_s1] sm:$0xff]   ;;  %137 = vmatprep.mubr.msk.bf16.mxu0 %vm146_vm1, %v145_v0  ;;  %20 = vst.msk [vmem:[#allocation2] sm:$0xff] %vm19_vm0, %v145_v0  ;;  %21 = vst.msk [vmem:[#allocation2 + $0x8] sm:$0xff] %vm19_vm0, %v145_v0  ;;  %v144_v2 = vld [vmem:[%s192_s1 + $0x8] sm:$0xff]   ;;  %vm115_vm3 = vcmask 519168  }
   0x2   :  { %134 = vmatpush3.bf16.msra.mxu0 %v143_v1  ;;  %v24_v3 = vld [vmem:[%s193_s0] sm:$0xff]  ;;  %v25_v4 = vld [vmem:[%s193_s0 + $0x8] sm:$0xff] }
   0x3   :  { %135 = vmatprep.subr.bf16.mxu0 %v145_v0  ;;  %v26_v5 = vpack.c.bf16 %v25_v4, %v24_v3  ;;  %v125_v14 = vld [vmem:[%s194_s2] ss:$0 sm:$0xff] }
   0x6   :  { %136 = vmatpush3.bf16.msra.mxu0 %v144_v2 }
   0x8   :  { %v22_v6 = vld [vmem:[#allocation2] sm:$0xff]  ;;  %v23_v8 = vld [vmem:[#allocation2 + $0x8] sm:$0xff] }
   0x9   :  { %138 = vmatmul.mubr.msk.bf16.vlgmr.msra.gmra.mrb[0].mxu0 %vm43_vm2, %v26_v5 }
  0xdc   :  { %v81_v7 = vpop.f32.mrb[0].mxu0 }
  0xdd   :  { %v88_v9 = vadd.f32 %v81_v7, %v22_v6  ;;  %v139_v10 = vpop.f32.mrb[1].mxu0 }
  0xde   :  { %v84_v11 = vpop.f32.mrb[2].mxu0 }
  0xdf   :  { %91 = vst.msk [vmem:[#allocation2] sm:$0xff] %vm19_vm0, %v88_v9  ;;  %v89_v12 = vadd.f32 %v84_v11, %v23_v8  ;;  %v140_v13 = vpop.f32.mrb[3].mxu0 }
  0xe1   :  { %92 = vst.msk [vmem:[#allocation2 + $0x8] sm:$0xff] %vm19_vm0, %v89_v12 }
  0xe6   :  { %v96_v15 = vld [vmem:[#allocation2] sm:$0xff] }
  0xe7   :  { %v105_v16 = vadd.f32 %v125_v14, %v96_v15 }
  0xe8   :  { %v97_v17 = vld [vmem:[#allocation2 + $0x8] sm:$0xff] }
  0xe9   :  { %v128_v18 = vpack.c.bf16 %v105_v16, %v105_v16  ;;  %v106_v19 = vadd.f32 %v125_v14, %v97_v17 }
  0xeb   :  { %116 = vst.msk [vmem:[%s195_s3] sm:$0xf] %vm115_vm3, %v128_v18  ;;  %v129_v20 = vpack.c.bf16 %v106_v19, %v106_v19 }
  0xed   :  { %117 = vst.msk [vmem:[%s195_s3 + $0x4] sm:$0xf] %vm115_vm3, %v129_v20 }

// kernel: transformer_decoder_layer.13
= control target key start
LH: loop header
LB: loop body
LE: loop exit
PB: predicated region body
PF: predicated region fallthrough
CT: control target
= control target key end

     0   :  { %10 = vsyncpa [#allocation3], 0  ;;  %s1345_s0 = inlined_call_operand.vmem [shape: bf16[2,4,8,8], index: 0, kind: input, shape index: {}]   ;;  %s1346_s1 = inlined_call_operand.vmem [shape: bf16[2,4,8,8], index: 1, kind: input, shape index: {}]   ;;  %s1347_s2 = inlined_call_operand.vmem [shape: bf16[2,4,8,8], index: 2, kind: input, shape index: {}]   ;;  %s1348_s3 = inlined_call_operand.vmem [shape: bf16[2,4,8,8], index: 3, kind: output, shape index: {0}]   ;;  %s1349_s4 = inlined_call_operand.hbm [shape: f32[2,8,8], index: 4, kind: output, shape index: {1}]  }
   0x1   :  { %12 = vsyncpa [#allocation3 + $0x1], 0  ;;  %s1171_s15 = smov 0   ;;  %s1173_s16 = smov 0  }
   0x2   :  { %s1175_s17 = smov 0   ;;  %s1177_s18 = smov 0  }
   0x3   :  { %s1179_s19 = smov 0   ;;  %s1181_s20 = smov 0  }
   0x4 LB: > { %s896_s21 = sadd.s32 4294967295, %s1141_s20   ;;  %s897_s22 = sadd.s32 4294967294, %s1141_s20   ;;  %s1141_s20 = sphi %s1181_s20, %s18_s20   ;;  %s1137_s19 = sphi %s1179_s19, %s1356_s19   ;;  %s1133_s18 = sphi %s1177_s18, %s1355_s18   ;;  %s1129_s17 = sphi %s1175_s17, %s1354_s17   ;;  %s1125_s16 = sphi %s1173_s16, %s1353_s16   ;;  %s1121_s15 = sphi %s1171_s15, %s1352_s15  }
   0x5   : > { %s30_s23 = sadd.s32 1, %s1137_s19  ;;  %s147_s24 = sadd.s32 1, %s1129_s17 }
   0x6   : > { %p32_p0 = scmp.ge.s32.totalorder %s30_s23, 2  ;;  %p157_p1 = scmp.ne.s32.totalorder %s1129_s17, %s1125_s16 }
   0x7   : > { %p158_p2 = scmp.eq.s32.totalorder %s896_s21, 1  ;;  %p163_p3 = scmp.ne.s32.totalorder %s1125_s16, %s1121_s15 }
   0x8   : > { %s1358_s23 = smov (%p32_p0, %s30_s23), 0  ;;  %p164_p5 = scmp.eq.s32.totalorder %s897_s22, 1 }
   0x9   : > { %p1211_p4 = por %p158_p2, %p157_p1  ;;  %s142_s26 = ssub.s32 %s1137_s19, %s1358_s23 }
   0xa   : > { %p900_p6 = scmp.ge.s32.totalorder %s1141_s20, 1  ;;  %p145_p7 = scmp.eq.s32.totalorder %s142_s26, 0 }
   0xb   : > { %p1218_p8 = por %p164_p5, %p163_p3  ;;  %p209_p9 = scmp.lt.s32.totalorder %s1141_s20, 3 }
   0xc   : > { %s1224_s28 = scalar_select %p145_p7, %s1129_s17, %s147_s24  }
   0xd   : > { %p210_p10 = pnand %p900_p6, %p209_p9 }
   0xe   : > { %p256_p11 = scmp.lt.s32.totalorder (!%p210_p10), %s1133_s18, 1  ;;  %v1143_v0 = vmov (!%p210_p10), 0.0   ;;  %vm1144_vm0 = vmmov (!%p210_p10), 0   ;;  %vm300_vm1 = vcmask (!%p210_p10), 64512   ;;  %vm536_vm2 = vcmask (!%p210_p10), 1043456   ;;  %s253_s14 = sand.u32 (!%p210_p10), 1, %s1125_s16  }
   0xf   : > { %213 = sbr.rel (%p210_p10) target bundleno = 790 (0x316), region = 32  ;;  %942 = vmatprep.subr.bf16.mxu0 (!%p210_p10), %v1143_v0  ;;  %948 = vmatprep.subr.bf16.mxu1 (!%p210_p10), %v1143_v0  ;;  %s901_s21 = sshll.u32 (!%p210_p10), %s253_s14, 3 }
  0x10   : > { %944 = vmatprep.mubr.msk.bf16.mxu0 (!%p210_p10), %vm1144_vm0, %v1143_v0  ;;  %950 = vmatprep.mubr.msk.bf16.mxu1 (!%p210_p10), %vm1144_vm0, %v1143_v0  ;;  %s255_s22 = scalar_lea.vmem (!%p210_p10), [#allocation2], %s901_s21  ;;  %s919_s24 = sshll.u32 (!%p210_p10), %s1133_s18, 7 }
  0x11   : > { %s762_s26 = sshll.u32 (!%p210_p10), %s255_s22, 4  ;;  %s1296_s6 = scalar_lea.hbm (!%p210_p10), %s1349_s4, %s919_s24  ;;  %s763_s26 = int_to_ptr.vmem [resolvable:$true] %s762_s26 }
  0x12   : > { %s1063_s8 = scalar_lea.vmem (!%p210_p10), %s763_s26, 128  ;;  %s1145_s9 = smov (!%p210_p10), [#allocation2]  }
  0x13   : > { %p1064_p12 = scmp.ne.s32.totalorder (!%p210_p10), %s763_s26, %s1063_s8 }
  0x15   : > { %p1065_p13 = pnand (!%p210_p10), %p1064_p12, %p1211_p4 }
  0x16   : > { %s257_s29 = scalar_select %p256_p11, %s1133_s18, 1 }
  0x17   : > { %p1066_p0 = pneg %p1065_p13 }
  0x18   : > { %s1234_s30 = sshll.u32 %s257_s29, 4 }
  0x19   : > { %s268_s7 = scalar_lea.vmem %s1346_s1, %s1234_s30  ;;  %s263_s10 = scalar_lea.vmem %s1345_s0, %s1234_s30 }
  0x1a   : > { %v292_v1 = vld [vmem:[%s268_s7] sm:$0xf]  ;;  %v293_v2 = vld [vmem:[%s268_s7 + $0x4] sm:$0xf]  ;;  %v294_v7 = vld [vmem:[%s268_s7 + $0x8] sm:$0xf]  ;;  %s273_s13 = scalar_lea.vmem %s1347_s2, %s1234_s30 }
  0x1b   : > { %v305_v3 = vsel %vm300_vm1, %v292_v1, 0  ;;  %v351_v4 = vsel %vm300_vm1, %v293_v2, 0  ;;  %v284_v5 = vld [vmem:[%s263_s10] sm:$0xf]  ;;  %v285_v6 = vld [vmem:[%s263_s10 + $0x4] sm:$0xf] }
  0x1c   : > { %943 = vmatpush3.bf16.xpose.msra.mxu0 %v305_v3  ;;  %949 = vmatpush3.bf16.xpose.msra.mxu1 %v351_v4  ;;  %v295_v8 = vld [vmem:[%s268_s7 + $0xc] sm:$0xf]  ;;  %v288_v9 = vmul.bf16 1052065461, %v284_v5  ;;  %v289_v10 = vmul.bf16 1052065461, %v285_v6 }
  0x1d   : > { %954 = vmatprep.subr.bf16.mxu0 %v1143_v0  ;;  %960 = vmatprep.subr.bf16.mxu1 %v1143_v0  ;;  %v397_v11 = vsel %vm300_vm1, %v294_v7, 0  ;;  %v443_v12 = vsel %vm300_vm1, %v295_v8, 0  ;;  %v286_v13 = vld [vmem:[%s263_s10 + $0x8] sm:$0xf]  ;;  %v287_v14 = vld [vmem:[%s263_s10 + $0xc] sm:$0xf] }
  0x1e   : > { %v290_v15 = vmul.bf16 1052065461, %v286_v13  ;;  %v291_v16 = vmul.bf16 1052065461, %v287_v14  ;;  %v296_v57 = vld [vmem:[%s273_s13] sm:$0xf] }
  0x1f   : > { %v538_v58 = vsel %vm536_vm2, %v296_v57, 0  ;;  %v297_v59 = vld [vmem:[%s273_s13 + $0x4] sm:$0xf]  ;;  %v298_v61 = vld [vmem:[%s273_s13 + $0x8] sm:$0xf]  ;;  %s745_s7 = scalar_lea.sflag [#allocation3], %s253_s14 }
  0x20   : > { %v584_v60 = vsel %vm536_vm2, %v297_v59, 0  ;;  %v630_v62 = vsel %vm536_vm2, %v298_v61, 0  ;;  %v299_v63 = vld [vmem:[%s273_s13 + $0xc] sm:$0xf]  ;;  %s1067_s10 = sshll.u32 %s1145_s9, 4  ;;  %s1068_s10 = int_to_ptr.vmem [resolvable:$false] %s1067_s10 }
  0x21   : > { %v676_v1 = vsel %vm536_vm2, %v299_v63, 0  ;;  %s1069_s11 = scalar_lea.vmem %s1068_s10, 256  ;;  %p1070_p1 = scmp.lt.s32.totalorder %s763_s26, %s1068_s10 }
  0x22   : > { %p1071_p2 = scmp.lt.s32.totalorder %s1069_s11, %s1063_s8 }
  0x23   : > { %945 = vmatmul.mubr.msk.bf16.vlgmr.msra.gmra.mrb[0].mxu0 %vm300_vm1, %v288_v9  ;;  %951 = vmatmul.mubr.msk.bf16.vlgmr.msra.gmra.mrb[0].mxu1 %vm300_vm1, %v289_v10 }
  0x24   : > { %955 = vmatpush3.bf16.xpose.msra.mxu0 %v397_v11  ;;  %961 = vmatpush3.bf16.xpose.msra.mxu1 %v443_v12  ;;  %p1072_p3 = por %p1071_p2, %p1070_p1 }
  0x25   : > { %956 = vmatprep.mubr.msk.bf16.mxu0 %vm1144_vm0, %v1143_v0  ;;  %962 = vmatprep.mubr.msk.bf16.mxu1 %vm1144_vm0, %v1143_v0 }
  0x26   : > { %966 = vmatprep.subr.bf16.mxu0 %v1143_v0  ;;  %972 = vmatprep.subr.bf16.mxu1 %v1143_v0  ;;  %p1073_p5 = pnand %p1072_p3, %p1066_p0 }
  0x2b   : > { %957 = vmatmul.mubr.msk.bf16.vlgmr.msra.gmra.mrb[4].mxu0 %vm300_vm1, %v290_v15  ;;  %963 = vmatmul.mubr.msk.bf16.vlgmr.msra.gmra.mrb[4].mxu1 %vm300_vm1, %v291_v16 }
  0x2c   : > { %968 = vmatprep.mubr.msk.bf16.mxu0 %vm1144_vm0, %v1143_v0  ;;  %974 = vmatprep.mubr.msk.bf16.mxu1 %vm1144_vm0, %v1143_v0 }
  0x2d   : > { %967 = vmatpush3.bf16.msra.mxu0 %v538_v58  ;;  %973 = vmatpush3.bf16.msra.mxu1 %v584_v60 }
  0x2e   : > { %978 = vmatprep.subr.bf16.mxu0 %v1143_v0  ;;  %984 = vmatprep.subr.bf16.mxu1 %v1143_v0 }
  0xf6   : > { %v341_v17 = vpop.f32.mrb[0].mxu0  ;;  %v387_v18 = vpop.f32.mrb[0].mxu1 }
  0xf7   : > { %v946_v19 = vpop.f32.mrb[1].mxu0  ;;  %v485_v20 = vsel %vm300_vm1, %v341_v17, -inf  ;;  %v952_v21 = vpop.f32.mrb[1].mxu1  ;;  %v488_v26 = vsel %vm300_vm1, %v387_v18, -inf }
  0xf8   : > { %486 = vmax.xlane.f32.xlu0 %v485_v20  ;;  %v344_v22 = vpop.f32.mrb[2].mxu0  ;;  %v390_v23 = vpop.f32.mrb[2].mxu1 }
  0xf9   : > { %v947_v24 = vpop.f32.mrb[3].mxu0  ;;  %v953_v25 = vpop.f32.mrb[3].mxu1 }
  0xfc   : > { %489 = vmax.xlane.f32.xlu0 %v488_v26 }
  0xfe   : > { %v433_v27 = vpop.f32.mrb[4].mxu0  ;;  %v479_v28 = vpop.f32.mrb[4].mxu1 }
  0xff   : > { %v958_v29 = vpop.f32.mrb[5].mxu0  ;;  %v491_v30 = vsel %vm300_vm1, %v433_v27, -inf  ;;  %v964_v31 = vpop.f32.mrb[5].mxu1  ;;  %v494_v36 = vsel %vm300_vm1, %v479_v28, -inf }
 0x100   : > { %492 = vmax.xlane.f32.xlu1 %v491_v30  ;;  %v436_v32 = vpop.f32.mrb[6].mxu0  ;;  %v482_v33 = vpop.f32.mrb[6].mxu1 }
 0x101   : > { %v959_v34 = vpop.f32.mrb[7].mxu0  ;;  %v965_v35 = vpop.f32.mrb[7].mxu1 }
 0x104   : > { %495 = vmax.xlane.f32.xlu1 %v494_v36 }
 0x185   : > { %v487_v37 = vpop.xlane.xlu0 %486 }
 0x186   : > { %v497_v38 = vsub.f32 %v341_v17, %v487_v37 }
 0x188   : > { %v501_v39 = vmul.f32 1.442695, %v497_v38 }
 0x189   : > { %v490_v40 = vpop.xlane.xlu0 %489 }
 0x18a   : > { %1047 = vpow2.f32 %v501_v39  ;;  %v498_v41 = vsub.f32 %v387_v18, %v490_v40 }
 0x18c   : > { %v503_v42 = vmul.f32 1.442695, %v498_v41 }
 0x18d   : > { %v493_v43 = vpop.xlane.xlu1 %492 }
 0x18e   : > { %1049 = vpow2.f32 %v503_v42  ;;  %v499_v44 = vsub.f32 %v433_v27, %v493_v43 }
 0x190   : > { %v505_v45 = vmul.f32 1.442695, %v499_v44 }
 0x191   : > { %v496_v46 = vpop.xlane.xlu1 %495 }
 0x192   : > { %1051 = vpow2.f32 %v505_v45  ;;  %v500_v47 = vsub.f32 %v479_v28, %v496_v46 }
 0x194   : > { %v1048_v48 = vpop.eup %1047  ;;  %v507_v49 = vmul.f32 1.442695, %v500_v47 }
 0x195   : > { %v509_v50 = vsel %vm300_vm1, %v1048_v48, 0.0 }
 0x196   : > { %1053 = vpow2.f32 %v507_v49  ;;  %510 = vadd.xlane.f32.xlu0 %v509_v50 }
 0x198   : > { %v1050_v51 = vpop.eup %1049 }
 0x199   : > { %v512_v52 = vsel %vm300_vm1, %v1050_v51, 0.0 }
 0x19a   : > { %513 = vadd.xlane.f32.xlu1 %v512_v52 }
 0x19c   : > { %v1052_v53 = vpop.eup %1051 }
 0x19d   : > { %v515_v54 = vsel %vm300_vm1, %v1052_v53, 0.0 }
 0x19e   : > { %516 = vadd.xlane.f32.xlu0 %v515_v54 }
 0x1a0   : > { %v1054_v55 = vpop.eup %1053 }
 0x1a1   : > { %v518_v56 = vsel %vm300_vm1, %v1054_v55, 0.0 }
 0x1a2   : > { %519 = vadd.xlane.f32.xlu1 %v518_v56 }
 0x223   : > { %v511_v2 = vpop.xlane.xlu0 %510 }
 0x224   : > { %1055 = vrcp.f32 %v511_v2 }
 0x227   : > { %v514_v3 = vpop.xlane.xlu1 %513 }
 0x228   : > { %1057 = vrcp.f32 %v514_v3 }
 0x22b   : > { %v517_v4 = vpop.xlane.xlu0 %516 }
 0x22c   : > { %1059 = vrcp.f32 %v517_v4 }
 0x22e   : > { %v1056_v5 = vpop.eup %1055 }
 0x22f   : > { %v525_v6 = vmul.f32 %v1056_v5, %v1048_v48  ;;  %v520_v7 = vpop.xlane.xlu1 %519 }
 0x230   : > { %1061 = vrcp.f32 %v520_v7 }
 0x231   : > { %v529_v8 = vpack.c.bf16 %v525_v6, %v525_v6  ;;  %v727_v16 = vsel %vm300_vm1, %v525_v6, 0.0 }
 0x232   : > { %v1058_v9 = vpop.eup %1057 }
 0x233   : > { %v526_v10 = vmul.f32 %v1058_v9, %v1050_v51  ;;  %969 = vmatmul.mubr.msk.bf16.vlgmr.msra.gmra.mrb[8].mxu0 %vm300_vm1, %v529_v8 }
 0x234   : > { %979 = vmatpush3.bf16.msra.mxu0 %v630_v62  ;;  %980 = vmatprep.mubr.msk.bf16.mxu0 %vm1144_vm0, %v1143_v0 }
 0x235   : > { %v530_v11 = vpack.c.bf16 %v526_v10, %v526_v10  ;;  %v728_v14 = vsel %vm300_vm1, %v526_v10, 0.0 }
 0x236   : > { %v1060_v12 = vpop.eup %1059  ;;  %v729_v19 = vadd.f32 %v728_v14, %v727_v16 }
 0x237   : > { %v527_v13 = vmul.f32 %v1060_v12, %v1052_v53  ;;  %975 = vmatmul.mubr.msk.bf16.vlgmr.msra.gmra.mrb[8].mxu1 %vm300_vm1, %v530_v11 }
 0x238   : > { %985 = vmatpush3.bf16.msra.mxu1 %v676_v1  ;;  %986 = vmatprep.mubr.msk.bf16.mxu1 %vm1144_vm0, %v1143_v0 }
 0x239   : > { %v531_v15 = vpack.c.bf16 %v527_v13, %v527_v13  ;;  %v730_v17 = vsel %vm300_vm1, %v527_v13, 0.0 }
 0x23a   : > { %v1062_v18 = vpop.eup %1061  ;;  %v731_v21 = vadd.f32 %v730_v17, %v729_v19 }
 0x23b   : > { %v528_v20 = vmul.f32 %v1062_v18, %v1054_v55  ;;  %981 = vmatmul.mubr.msk.bf16.vlgmr.msra.gmra.mrb[12].mxu0 %vm300_vm1, %v531_v15 }
 0x23d   : > { %v532_v22 = vpack.c.bf16 %v528_v20, %v528_v20  ;;  %v732_v23 = vsel %vm300_vm1, %v528_v20, 0.0 }
 0x23e   : > { %v733_v24 = vadd.f32 %v732_v23, %v731_v21 }
 0x23f   : > { %987 = vmatmul.mubr.msk.bf16.vlgmr.msra.gmra.mrb[12].mxu1 %vm300_vm1, %v532_v22 }
 0x240   : > { %v734_v0 = vmul.f32 0.25, %v733_v24 }
 0x242   : > { %735 = vst.msk [vmem:[%s255_s22] sm:$0xff] %vm300_vm1, %v734_v0 }
 0x243   : > { %1076 = shalt.err (!%p1073_p5)
}
 0x244   : > { %s1077_s18 = scalar_lea.hbm %s1296_s6, 128  ;;  %s1081_s14 = scalar_lea.hbm %s1349_s4, 256 }
 0x245   : > { %p1078_p6 = scmp.ne.s32.totalorder %s1296_s6, %s1077_s18  ;;  %p1082_p10 = scmp.lt.u32.totalorder %s1296_s6, %s1349_s4 }
 0x246   : > { %p1083_p11 = scmp.lt.u32.totalorder %s1081_s14, %s1077_s18  ;;  %p1085_p13 = scmp.lt.u32.totalorder %s1077_s18, %s1296_s6 }
 0x247   : > { %p1079_p7 = pnand %p1078_p6, %p1211_p4 }
 0x248   : > { %p1084_p12 = por %p1083_p11, %p1082_p10 }
 0x249   : > { %p1080_p9 = pneg %p1079_p7 }
 0x24a   : > { %p1086_p0 = por %p1085_p13, %p1084_p12 }
 0x24c   : > { %p1087_p1 = pnand %p1086_p0, %p1080_p9 }
 0x24e   : > { %1090 = shalt.err (!%p1087_p1)
}
 0x24f   : > { %990 = dma.vmem_to_hbm [thread:$0]  (%p1211_p4), %s763_s26, 128, %s1296_s6, %s745_s7   ;;  %vm722_vm3 = vcmask 60416  }
 0x250   : > { %s281_s5 = scalar_lea.vmem %s1348_s3, %s1234_s30 }
 0x306   : > { %v574_v25 = vpop.f32.mrb[8].mxu0 }
 0x307   : > { %v718_v26 = vpack.c.bf16 %v574_v25, %v574_v25  ;;  %v970_v27 = vpop.f32.mrb[9].mxu0 }
 0x308   : > { %v577_v28 = vpop.f32.mrb[10].mxu0 }
 0x309   : > { %723 = vst.msk [vmem:[%s281_s5] sm:$0xf] %vm722_vm3, %v718_v26  ;;  %v971_v29 = vpop.f32.mrb[11].mxu0 }
 0x30a   : > { %v620_v30 = vpop.f32.mrb[8].mxu1 }
 0x30b   : > { %v719_v31 = vpack.c.bf16 %v620_v30, %v620_v30  ;;  %v976_v32 = vpop.f32.mrb[9].mxu1 }
 0x30c   : > { %v623_v33 = vpop.f32.mrb[10].mxu1 }
 0x30d   : > { %724 = vst.msk [vmem:[%s281_s5 + $0x4] sm:$0xf] %vm722_vm3, %v719_v31  ;;  %v977_v34 = vpop.f32.mrb[11].mxu1 }
 0x30e   : > { %v666_v35 = vpop.f32.mrb[12].mxu0 }
 0x30f   : > { %v720_v36 = vpack.c.bf16 %v666_v35, %v666_v35  ;;  %v982_v37 = vpop.f32.mrb[13].mxu0 }
 0x310   : > { %v669_v38 = vpop.f32.mrb[14].mxu0 }
 0x311   : > { %725 = vst.msk [vmem:[%s281_s5 + $0x8] sm:$0xf] %vm722_vm3, %v720_v36  ;;  %v983_v39 = vpop.f32.mrb[15].mxu0 }
 0x312   : > { %v712_v40 = vpop.f32.mrb[12].mxu1 }
 0x313   : > { %v721_v41 = vpack.c.bf16 %v712_v40, %v712_v40  ;;  %v988_v42 = vpop.f32.mrb[13].mxu1 }
 0x314   : > { %v715_v43 = vpop.f32.mrb[14].mxu1 }
 0x315   : > { %726 = vst.msk [vmem:[%s281_s5 + $0xc] sm:$0xf] %vm722_vm3, %v721_v41  ;;  %v989_v44 = vpop.f32.mrb[15].mxu1 }
 0x316 PF: > { %p996_p4 = scmp.ge.s32.totalorder %s1141_s20, 2  ;;  %s785_s25 = sand.u32 1, %s1121_s15  }
 0x317   : > { %s786_s30 = scalar_lea.sflag [#allocation3], %s785_s25 }
 0x318   : > { %p993_p2 = pnand %p996_p4, %p1218_p8 }
 0x31a   : > { %1116 = dma.done.wait (!%p993_p2), %s786_s30, 128  }
 0x31b   : > { %1118 = vsyncadd (!%p993_p2), %s786_s30, 4294967168  ;;  %s18_s20 = sadd.s32 1, %s1141_s20   ;;  %s1352_s15 = smov %s1125_s16 }
 0x31c   : > { %p15_p3 = scmp.ge.s32.totalorder %s18_s20, 4   ;;  %s1353_s16 = smov %s1129_s17 }
 0x31d   : > { %s1354_s17 = smov %s1224_s28  ;;  %s1355_s18 = smov %s1137_s19 }
 0x31e   : > { %s1356_s19 = smov %s1358_s23  ;;  %17 = sbr.rel (!%p15_p3) target bundleno = 4 (0x4), region = 85 }
 0x325   :  { %791 = vsyncpa [#allocation3], 1 }
 0x326   :  { %793 = vsyncpa [#allocation3 + $0x1], 1 }

// kernel: transformer_decoder_layer.15
= control target key start
LH: loop header
LB: loop body
LE: loop exit
PB: predicated region body
PF: predicated region fallthrough
CT: control target
= control target key end

     0   :  { %vm34_vm0 = vcmask 261120   ;;  %v315_v0 = vmov 0.0   ;;  %vm316_vm1 = vmmov 0   ;;  %vm145_vm2 = vcmask 523264   ;;  %s421_s1 = inlined_call_operand.vmem [shape: bf16[32,64], index: 1, kind: input, shape index: {}]   ;;  %s422_s0 = inlined_call_operand.vmem [shape: f32[16,32], index: 0, kind: input, shape index: {}, may-alias: {0,5}]   ;;  %s423_s3 = inlined_call_operand.vmem [shape: bf16[64,32], index: 3, kind: input, shape index: {}]   ;;  %s424_s2 = inlined_call_operand.vmem [shape: f32[1,64], index: 2, kind: input, shape index: {}]   ;;  %s425_s4 = inlined_call_operand.vmem [shape: f32[1,32], index: 4, kind: input, shape index: {}]   ;;  %s426_s5 = inlined_call_operand.vmem [shape: f32[16,32], index: 5, kind: input, shape index: {}, may-alias: {0,5}]   ;;  %s427_s6 = inlined_call_operand.vmem [shape: f32[1,32], index: 6, kind: input, shape index: {}]   ;;  %s428_s7 = inlined_call_operand.vmem [shape: f32[1,32], index: 7, kind: input, shape index: {}]   ;;  %s429_s8 = inlined_call_operand.vmem [shape: f32[16,32], index: 8, kind: output, shape index: {}]  }
   0x1   :  { %283 = vmatprep.subr.bf16.mxu0 %v315_v0  ;;  %v305_v1 = vld [vmem:[%s421_s1] sm:$0xff]   ;;  %287 = vmatprep.mubr.msk.bf16.mxu0 %vm316_vm1, %v315_v0  ;;  %35 = vst.msk [vmem:[#allocation2] sm:$0xff] %vm34_vm0, %v315_v0  ;;  %36 = vst.msk [vmem:[#allocation2 + $0x8] sm:$0xff] %vm34_vm0, %v315_v0  ;;  %v306_v2 = vld [vmem:[%s421_s1 + $0x8] sm:$0xff]  }
   0x2   :  { %291 = vmatprep.subr.bf16.mxu1 %v315_v0  ;;  %299 = vmatprep.mubr.msk.bf16.mxu1 %vm316_vm1, %v315_v0  ;;  %v37_v3 = vld [vmem:[%s422_s0] sm:$0xff]  ;;  %v38_v4 = vld [vmem:[%s422_s0 + $0x8] sm:$0xff]  ;;  %v309_v8 = vld [vmem:[%s423_s3 + $0x10] sm:$0xff]  }
   0x3   :  { %284 = vmatpush3.bf16.msra.mxu0 %v305_v1  ;;  %v307_v5 = vld [vmem:[%s423_s3] sm:$0xff]   ;;  %v308_v6 = vld [vmem:[%s423_s3 + $0x8] sm:$0xff]   ;;  %v39_v7 = vpack.c.bf16 %v38_v4, %v37_v3  ;;  %v310_v9 = vld [vmem:[%s423_s3 + $0x18] sm:$0xff]  }
   0x4   :  { %285 = vmatprep.subr.bf16.mxu0 %v315_v0  ;;  %292 = vmatpush3.bf16.msra.mxu1 %v307_v5  ;;  %v263_v10 = vld [vmem:[%s424_s2] ss:$0 sm:$0xff]  ;;  %v209_v33 = vld [vmem:[%s426_s5 + $0x8] sm:$0xff] }
   0x5   :  { %293 = vmatprep.subr.bf16.mxu1 %v315_v0  ;;  %v272_v28 = vld [vmem:[%s425_s4] ss:$0 sm:$0xff] }
   0x6   :  { %v208_v30 = vld [vmem:[%s426_s5] sm:$0xff] }
   0x7   :  { %286 = vmatpush3.bf16.msra.mxu0 %v306_v2  ;;  %v273_v56 = vld [vmem:[%s427_s6] ss:$0 sm:$0xff] }
   0x8   :  { %294 = vmatpush3.bf16.msra.mxu1 %v308_v6  ;;  %v111_v20 = vld [vmem:[#allocation2] sm:$0xff]  ;;  %v112_v22 = vld [vmem:[#allocation2 + $0x8] sm:$0xff] }
   0x9   :  { %295 = vmatprep.subr.bf16.mxu1 %v315_v0  ;;  %v274_v58 = vld [vmem:[%s428_s7] ss:$0 sm:$0xff] }
   0xa   :  { %288 = vmatmul.mubr.msk.bf16.vlgmr.msra.gmra.mrb[0].mxu0 %vm34_vm0, %v39_v7 }
   0xc   :  { %296 = vmatpush3.bf16.msra.mxu1 %v309_v8 }
   0xd   :  { %297 = vmatprep.subr.bf16.mxu1 %v315_v0 }
  0x10   :  { %298 = vmatpush3.bf16.msra.mxu1 %v310_v9 }
  0xdd   :  { %v101_v11 = vpop.f32.mrb[0].mxu0 }
  0xde   :  { %v102_v12 = vadd.f32 %v263_v10, %v101_v11  ;;  %v289_v13 = vpop.f32.mrb[1].mxu0 }
  0xdf   :  { %v104_v14 = vpop.f32.mrb[2].mxu0 }
  0xe0   :  { %v105_v15 = vadd.f32 %v263_v10, %v104_v14  ;;  %v290_v16 = vpop.f32.mrb[3].mxu0  ;;  %v108_v17 = vmax.f32 %v102_v12, 0.0 }
  0xe2   :  { %v109_v18 = vmax.f32 %v105_v15, 0.0 }
  0xe4   :  { %v110_v19 = vpack.c.bf16 %v109_v18, %v108_v17 }
  0xe6   :  { %300 = vmatmul.mubr.msk.bf16.vlgmr.msra.gmra.mrb[0].mxu1 %vm145_vm2, %v110_v19 }
 0x1b9   :  { %v183_v21 = vpop.f32.mrb[0].mxu1 }
 0x1ba   :  { %v190_v23 = vadd.f32 %v183_v21, %v111_v20  ;;  %v301_v24 = vpop.f32.mrb[1].mxu1 }
 0x1bb   :  { %v186_v25 = vpop.f32.mrb[2].mxu1 }
 0x1bc   :  { %192 = vst.msk [vmem:[#allocation2] sm:$0xff] %vm34_vm0, %v190_v23  ;;  %v191_v26 = vadd.f32 %v186_v25, %v112_v22  ;;  %v302_v27 = vpop.f32.mrb[3].mxu1 }
 0x1be   :  { %193 = vst.msk [vmem:[#allocation2 + $0x8] sm:$0xff] %vm34_vm0, %v191_v26 }
 0x1c3   :  { %v197_v29 = vld [vmem:[#allocation2] sm:$0xff] }
 0x1c4   :  { %v206_v31 = vadd.f32 %v272_v28, %v197_v29 }
 0x1c5   :  { %v198_v32 = vld [vmem:[#allocation2 + $0x8] sm:$0xff] }
 0x1c6   :  { %v210_v34 = vadd.f32 %v208_v30, %v206_v31  ;;  %v207_v35 = vadd.f32 %v272_v28, %v198_v32 }
 0x1c8   :  { %v212_v36 = vsel %vm34_vm0, %v210_v34, 0.0  ;;  %v211_v37 = vadd.f32 %v209_v33, %v207_v35 }
 0x1c9   :  { %213 = vadd.xlane.f32.xlu0 %v212_v36 }
 0x1ca   :  { %v215_v38 = vsel %vm34_vm0, %v211_v37, 0.0 }
 0x1cd   :  { %216 = vadd.xlane.f32.xlu0 %v215_v38 }
 0x256   :  { %v214_v39 = vpop.xlane.xlu0 %213 }
 0x257   :  { %v219_v40 = vmul.f32 0.03125, %v214_v39 }
 0x259   :  { %v221_v41 = vsub.f32 %v210_v34, %v219_v40 }
 0x25a   :  { %v217_v42 = vpop.xlane.xlu0 %216 }
 0x25b   :  { %v220_v43 = vmul.f32 0.03125, %v217_v42  ;;  %v223_v44 = vmul.f32 %v221_v41, %v221_v41 }
 0x25d   :  { %v222_v45 = vsub.f32 %v211_v37, %v220_v43  ;;  %v225_v46 = vsel %vm34_vm0, %v223_v44, 0.0 }
 0x25e   :  { %226 = vadd.xlane.f32.xlu1 %v225_v46 }
 0x25f   :  { %v224_v47 = vmul.f32 %v222_v45, %v222_v45 }
 0x261   :  { %v228_v48 = vsel %vm34_vm0, %v224_v47, 0.0 }
 0x262   :  { %229 = vadd.xlane.f32.xlu1 %v228_v48 }
 0x2eb   :  { %v227_v49 = vpop.xlane.xlu1 %226 }
 0x2ec   :  { %v231_v50 = vmul.f32 0.03125, %v227_v49 }
 0x2ee   :  { %v233_v51 = vadd.f32 1e-05, %v231_v50 }
 0x2ef   :  { %v230_v52 = vpop.xlane.xlu1 %229 }
 0x2f0   :  { %311 = vrsqrt.f32 %v233_v51  ;;  %v232_v53 = vmul.f32 0.03125, %v230_v52 }
 0x2f2   :  { %v234_v54 = vadd.f32 1e-05, %v232_v53 }
 0x2f4   :  { %313 = vrsqrt.f32 %v234_v54 }
 0x2fa   :  { %v312_v55 = vpop.eup %311 }
 0x2fb   :  { %v237_v57 = vmul.f32 %v312_v55, %v221_v41 }
 0x2fd   :  { %v246_v59 = vmul.f32 %v273_v56, %v237_v57 }
 0x2fe   :  { %v314_v60 = vpop.eup %313 }
 0x2ff   :  { %v255_v61 = vadd.f32 %v274_v58, %v246_v59  ;;  %v238_v62 = vmul.f32 %v314_v60, %v222_v45 }
 0x301   :  { %257 = vst.msk [vmem:[%s429_s8] sm:$0xff] %vm34_vm0, %v255_v61  ;;  %v247_v63 = vmul.f32 %v273_v56, %v238_v62 }
 0x303   :  { %v256_v0 = vadd.f32 %v274_v58, %v247_v63 }
 0x305   :  { %258 = vst.msk [vmem:[%s429_s8 + $0x8] sm:$0xff] %vm34_vm0, %v256_v0 }

</bundles_post_ra>
